<compile_context>
chip_gen: v7x
topology: tpu7x:2x2x1
jax: 0.10.0
libtpu: 0.0.40
codegen_flags: <defaults>
</compile_context>

<pallas_src>
import numpy as np
import jax
import jax.numpy as jnp
from jax.experimental import pallas as pl
from jax.experimental.pallas import tpu as pltpu

NEG_SLOPE = 0.1     # nn.LeakyReLU(0.1)
BN_EPS = 1e-5       # nn.BatchNorm2d default eps
K = 5               # LeNet-5 conv kernel size


# ---------------------------------------------------------------------------
# Host-side constant builders (pure parameter preprocessing, done once).
# ---------------------------------------------------------------------------

def _conv_band_matrices(w, w_in):
    """w: (Cout, Cin, K, K) -> (K, w_in*Cin, OW*Cout) banded matrices.

    With activations laid out as A[h, w*Cin + ci], the conv becomes
        y[oh, ow*Cout + co] = sum_i  A[oh+i, :] @ M[i]
    which equals nn.Conv2d (cross-correlation, stride 1, no padding), bias excluded.
    """
    w = np.asarray(w, np.float32)
    cout, cin, k, _ = w.shape
    ow_n = w_in - k + 1
    m = np.zeros((k, w_in * cin, ow_n * cout), np.float32)
    for i in range(k):
        for j in range(k):
            blk = w[:, :, i, j].T                       # (Cin, Cout)
            for ow in range(ow_n):
                r = (ow + j) * cin
                c = ow * cout
                m[i, r:r + cin, c:c + cout] = blk
    return m


def _pool_row_matrix(h):
    """(h//2, h) matrix averaging adjacent row pairs (factor 0.5 each)."""
    p = np.zeros((h // 2, h), np.float32)
    for r in range(h // 2):
        p[r, 2 * r] = 0.5
        p[r, 2 * r + 1] = 0.5
    return p


def _pool_col_matrix(w, c):
    """(w*c, (w//2)*c) matrix averaging adjacent w pairs per channel (interleaved lanes)."""
    p = np.zeros((w * c, (w // 2) * c), np.float32)
    for w2 in range(w // 2):
        for ch in range(c):
            p[(2 * w2) * c + ch, w2 * c + ch] = 0.5
            p[(2 * w2 + 1) * c + ch, w2 * c + ch] = 0.5
    return p


def _bn_rows(gamma, beta, mean, var, conv_bias, ow):
    """Fold conv bias + BatchNorm(eval) into per-lane scale/shift row vectors."""
    s = np.asarray(gamma, np.float64) / np.sqrt(np.asarray(var, np.float64) + BN_EPS)
    t = np.asarray(beta, np.float64) + s * (np.asarray(conv_bias, np.float64)
                                            - np.asarray(mean, np.float64))
    scale = np.tile(s.astype(np.float32), ow)[None, :]
    shift = np.tile(t.astype(np.float32), ow)[None, :]
    return scale, shift


def _xavier_uniform(key, shape, fan_in, fan_out):
    bound = float(np.sqrt(6.0 / (fan_in + fan_out)))
    return jax.random.uniform(key, shape, jnp.float32, -bound, bound)


def init_params(key, in_channel, n_classes):
    """Parameters in PyTorch layout (weights xavier_uniform, biases zero, BN eval stats)."""
    ks = jax.random.split(key, 5)
    p = {}
    for name, k_, cin, cout in [("conv0", ks[0], in_channel, 6),
                                ("conv1", ks[1], 6, 16),
                                ("conv2", ks[2], 16, 120)]:
        p[name + "_w"] = _xavier_uniform(k_, (cout, cin, K, K), cin * K * K, cout * K * K)
        p[name + "_b"] = jnp.zeros((cout,), jnp.float32)
    p["fc0_w"] = _xavier_uniform(ks[3], (84, 120), 120, 84)
    p["fc0_b"] = jnp.zeros((84,), jnp.float32)
    p["fc1_w"] = _xavier_uniform(ks[4], (n_classes, 84), 84, n_classes)
    p["fc1_b"] = jnp.zeros((n_classes,), jnp.float32)
    for name, c in [("bn0", 6), ("bn1", 16), ("bn2", 120)]:
        p[name + "_gamma"] = jnp.ones((c,), jnp.float32)
        p[name + "_beta"] = jnp.zeros((c,), jnp.float32)
        p[name + "_mean"] = jnp.zeros((c,), jnp.float32)
        p[name + "_var"] = jnp.ones((c,), jnp.float32)
    return p


def build_constants(params, in_h, in_w):
    """Turn PyTorch-layout params into the matrices the fused kernel consumes."""
    oh0, ow0 = in_h - K + 1, in_w - K + 1        # conv0 out (28, 28)
    h1, w1 = oh0 // 2, ow0 // 2                  # pool0 out (14, 14)
    oh1, ow1 = h1 - K + 1, w1 - K + 1            # conv1 out (10, 10)
    h2, w2 = oh1 // 2, ow1 // 2                  # pool1 out (5, 5)
    assert h2 - K + 1 == 1 and w2 - K + 1 == 1, "LeNet-5 arithmetic requires 32x32 input"

    c = {}
    c["m0"] = _conv_band_matrices(params["conv0_w"], in_w)     # (5, 32*Cin, 168)
    c["m1"] = _conv_band_matrices(params["conv1_w"], w1)       # (5, 84, 160)
    c["m2"] = _conv_band_matrices(params["conv2_w"], w2)       # (5, 80, 120)
    c["s0"], c["t0"] = _bn_rows(params["bn0_gamma"], params["bn0_beta"],
                                params["bn0_mean"], params["bn0_var"],
                                params["conv0_b"], ow0)
    c["s1"], c["t1"] = _bn_rows(params["bn1_gamma"], params["bn1_beta"],
                                params["bn1_mean"], params["bn1_var"],
                                params["conv1_b"], ow1)
    c["s2"], c["t2"] = _bn_rows(params["bn2_gamma"], params["bn2_beta"],
                                params["bn2_mean"], params["bn2_var"],
                                params["conv2_b"], 1)
    c["ph0"] = _pool_row_matrix(oh0)                           # (14, 28)
    c["pw0"] = _pool_col_matrix(ow0, 6)                        # (168, 84)
    c["ph1"] = _pool_row_matrix(oh1)                           # (5, 10)
    c["pw1"] = _pool_col_matrix(ow1, 16)                       # (160, 80)
    c["fc0_w"] = np.asarray(params["fc0_w"]).T.astype(np.float32)       # (120, 84)
    c["fc0_b"] = np.asarray(params["fc0_b"])[None, :].astype(np.float32)
    c["fc1_w"] = np.asarray(params["fc1_w"]).T.astype(np.float32)       # (84, nc)
    c["fc1_b"] = np.asarray(params["fc1_b"])[None, :].astype(np.float32)
    return {k: jnp.asarray(v) for k, v in c.items()}


# ---------------------------------------------------------------------------
# The single fused Pallas kernel (one grid step == one image).
# ---------------------------------------------------------------------------

def _lenet5_fused_kernel(x_ref,
                         m0_ref, s0_ref, t0_ref, ph0_ref, pw0_ref,
                         m1_ref, s1_ref, t1_ref, ph1_ref, pw1_ref,
                         m2_ref, s2_ref, t2_ref,
                         w0_ref, b0_ref, w1_ref, b1_ref,
                         probs_ref, arg_ref):
    f32 = jnp.float32

    def conv_bn_lrelu(a, m_ref, s_ref, t_ref):
        # a: (H, W*Cin) interleaved; m_ref: (K, W*Cin, OW*Cout) banded weights.
        k = m_ref.shape[0]
        oh = a.shape[0] - k + 1
        y = jnp.dot(a[0:oh, :], m_ref[0], preferred_element_type=f32)
        for i in range(1, k):
            y = y + jnp.dot(a[i:i + oh, :], m_ref[i], preferred_element_type=f32)
        y = y * s_ref[...] + t_ref[...]                  # conv bias + BatchNorm(eval)
        return jnp.where(y > 0.0, y, NEG_SLOPE * y)      # LeakyReLU(0.1)

    def avg_pool2x2(y, ph_ref, pw_ref):
        # AvgPool2d(2, 2) as two matmuls: rows, then channel-interleaved lanes.
        p = jnp.dot(ph_ref[...], y, preferred_element_type=f32)
        return jnp.dot(p, pw_ref[...], preferred_element_type=f32)

    a0 = x_ref[0]                                        # (32, 32*Cin)
    y0 = conv_bn_lrelu(a0, m0_ref, s0_ref, t0_ref)       # (28, 168)
    p0 = avg_pool2x2(y0, ph0_ref, pw0_ref)               # (14, 84)
    y1 = conv_bn_lrelu(p0, m1_ref, s1_ref, t1_ref)       # (10, 160)
    p1 = avg_pool2x2(y1, ph1_ref, pw1_ref)               # (5, 80)
    feat = conv_bn_lrelu(p1, m2_ref, s2_ref, t2_ref)     # (1, 120) == torch.flatten

    # FC head (fc0 -> dropout(eval) -> leakyrelu -> fc1 -> softmax -> argmax)
    h = jnp.dot(feat, w0_ref[...], preferred_element_type=f32) + b0_ref[...]
    # TODO(synk): Dropout(p=0.3) implemented as eval-mode identity (no RNG mask).
    h = jnp.where(h > 0.0, h, NEG_SLOPE * h)
    logits = jnp.dot(h, w1_ref[...], preferred_element_type=f32) + b1_ref[...]

    m = jnp.max(logits, axis=1, keepdims=True)
    e = jnp.exp(logits - m)
    probs = e / jnp.sum(e, axis=1, keepdims=True)
    probs_ref[0] = probs                                 # (1, n_classes)

    pm = jnp.max(probs, axis=1, keepdims=True)
    ids = jax.lax.broadcasted_iota(jnp.int32, probs.shape, 1)
    cand = jnp.where(probs >= pm, ids, probs.shape[1])   # first occurrence on ties
    arg_ref[0] = jnp.min(cand, axis=1, keepdims=True)    # (1, 1) int32


# ---------------------------------------------------------------------------
# Wrapper
# ---------------------------------------------------------------------------

def _const_spec(arr):
    zeros = (0,) * arr.ndim

    def idx(i):
        return zeros

    return pl.BlockSpec(arr.shape, idx)


_CONST_ORDER = ["m0", "s0", "t0", "ph0", "pw0",
                "m1", "s1", "t1", "ph1", "pw1",
                "m2", "s2", "t2",
                "fc0_w", "fc0_b", "fc1_w", "fc1_b"]


def lenet5_forward(x_nchw, consts, n_classes, is_train=False):
    b, cin, h, w = x_nchw.shape
    # One-time boundary relayout: NCHW -> rows = H, lanes = W*C (channel-minor).
    x_rows = jnp.transpose(x_nchw, (0, 2, 3, 1)).reshape(b, h, w * cin)

    in_specs = [pl.BlockSpec((1, h, w * cin), lambda i: (i, 0, 0))]
    in_specs += [_const_spec(consts[name]) for name in _CONST_ORDER]

    probs, arg = pl.pallas_call(
        _lenet5_fused_kernel,
        out_shape=(jax.ShapeDtypeStruct((b, 1, n_classes), jnp.float32),
                   jax.ShapeDtypeStruct((b, 1, 1), jnp.int32)),
        grid=(b,),
        in_specs=in_specs,
        out_specs=(pl.BlockSpec((1, 1, n_classes), lambda i: (i, 0, 0)),
                   pl.BlockSpec((1, 1, 1), lambda i: (i, 0, 0))),
        compiler_params=pltpu.CompilerParams(dimension_semantics=("parallel",)),
    )(x_rows, *[consts[name] for name in _CONST_ORDER])

    if not is_train:
        return arg[:, 0, 0]        # (B,) argmax class indices
    return probs[:, 0, :]          # (B, n_classes) softmax probabilities


if __name__ == "__main__":
    batch, n_classes, in_channel = 2, 10, 1
    in_h = in_w = 32               # LeNet-5 arithmetic requires 32x32 input

    key = jax.random.PRNGKey(0)
    pkey, xkey = jax.random.split(key)
    params = init_params(pkey, in_channel, n_classes)
    consts = build_constants(params, in_h, in_w)
    x = jax.random.normal(xkey, (batch, in_channel, in_h, in_w), jnp.float32)

    pred = lenet5_forward(x, consts, n_classes, is_train=False)
    pred = jax.block_until_ready(pred)
    assert pred.shape == (batch,)

    probs = lenet5_forward(x, consts, n_classes, is_train=True)
    probs = jax.block_until_ready(probs)
    assert probs.shape == (batch, n_classes)
    assert bool(jnp.all(jnp.abs(jnp.sum(probs, axis=1) - 1.0) < 1e-3))

    print("KERNEL_OK")
</pallas_src>

<mosaic_0001>
module attributes {stable_mosaic.version = 11 : i64} {
  func.func @_lenet5_fused_kernel(%arg0: i32, %arg1: memref<1x32x32xf32, #tpu.memory_space<vmem>>, %arg2: memref<5x32x168xf32, #tpu.memory_space<vmem>>, %arg3: memref<1x168xf32, #tpu.memory_space<vmem>>, %arg4: memref<1x168xf32, #tpu.memory_space<vmem>>, %arg5: memref<14x28xf32, #tpu.memory_space<vmem>>, %arg6: memref<168x84xf32, #tpu.memory_space<vmem>>, %arg7: memref<5x84x160xf32, #tpu.memory_space<vmem>>, %arg8: memref<1x160xf32, #tpu.memory_space<vmem>>, %arg9: memref<1x160xf32, #tpu.memory_space<vmem>>, %arg10: memref<5x10xf32, #tpu.memory_space<vmem>>, %arg11: memref<160x80xf32, #tpu.memory_space<vmem>>, %arg12: memref<5x80x120xf32, #tpu.memory_space<vmem>>, %arg13: memref<1x120xf32, #tpu.memory_space<vmem>>, %arg14: memref<1x120xf32, #tpu.memory_space<vmem>>, %arg15: memref<120x84xf32, #tpu.memory_space<vmem>>, %arg16: memref<1x84xf32, #tpu.memory_space<vmem>>, %arg17: memref<84x10xf32, #tpu.memory_space<vmem>>, %arg18: memref<1x10xf32, #tpu.memory_space<vmem>>, %arg19: memref<1x1x10xf32, #tpu.memory_space<vmem>>, %arg20: memref<1x1x1xi32, #tpu.memory_space<vmem>>) attributes {dimension_semantics = [#tpu.dimension_semantics<parallel>], iteration_bounds = array<i64: 2>, scalar_prefetch = 0 : i64, scratch_operands = 0 : i64, tpu.core_type = #tpu.core_type<tc>, window_params = [{transform_indices = @transform_0, window_bounds = array<i64: 1, 32, 32>}, {pipeline_mode = #tpu.pipeline_mode<synchronous>, transform_indices = @transform_1, window_bounds = array<i64: 5, 32, 168>}, {pipeline_mode = #tpu.pipeline_mode<synchronous>, transform_indices = @transform_2, window_bounds = array<i64: 1, 168>}, {pipeline_mode = #tpu.pipeline_mode<synchronous>, transform_indices = @transform_3, window_bounds = array<i64: 1, 168>}, {pipeline_mode = #tpu.pipeline_mode<synchronous>, transform_indices = @transform_4, window_bounds = array<i64: 14, 28>}, {pipeline_mode = #tpu.pipeline_mode<synchronous>, transform_indices = @transform_5, window_bounds = array<i64: 168, 84>}, {pipeline_mode = #tpu.pipeline_mode<synchronous>, transform_indices = @transform_6, window_bounds = array<i64: 5, 84, 160>}, {pipeline_mode = #tpu.pipeline_mode<synchronous>, transform_indices = @transform_7, window_bounds = array<i64: 1, 160>}, {pipeline_mode = #tpu.pipeline_mode<synchronous>, transform_indices = @transform_8, window_bounds = array<i64: 1, 160>}, {pipeline_mode = #tpu.pipeline_mode<synchronous>, transform_indices = @transform_9, window_bounds = array<i64: 5, 10>}, {pipeline_mode = #tpu.pipeline_mode<synchronous>, transform_indices = @transform_10, window_bounds = array<i64: 160, 80>}, {pipeline_mode = #tpu.pipeline_mode<synchronous>, transform_indices = @transform_11, window_bounds = array<i64: 5, 80, 120>}, {pipeline_mode = #tpu.pipeline_mode<synchronous>, transform_indices = @transform_12, window_bounds = array<i64: 1, 120>}, {pipeline_mode = #tpu.pipeline_mode<synchronous>, transform_indices = @transform_13, window_bounds = array<i64: 1, 120>}, {pipeline_mode = #tpu.pipeline_mode<synchronous>, transform_indices = @transform_14, window_bounds = array<i64: 120, 84>}, {pipeline_mode = #tpu.pipeline_mode<synchronous>, transform_indices = @transform_15, window_bounds = array<i64: 1, 84>}, {pipeline_mode = #tpu.pipeline_mode<synchronous>, transform_indices = @transform_16, window_bounds = array<i64: 84, 10>}, {pipeline_mode = #tpu.pipeline_mode<synchronous>, transform_indices = @transform_17, window_bounds = array<i64: 1, 10>}, {transform_indices = @transform_18, window_bounds = array<i64: 1, 1, 10>}, {transform_indices = @transform_19, window_bounds = array<i64: 1, 1, 1>}]} {
    %c0 = arith.constant 0 : index
    %c0_0 = arith.constant 0 : index
    %c0_1 = arith.constant 0 : index
    %0 = vector.load %arg1[%c0, %c0_0, %c0_1] : memref<1x32x32xf32, #tpu.memory_space<vmem>>, vector<1x32x32xf32>
    %1 = vector.shape_cast %0 : vector<1x32x32xf32> to vector<32x32xf32>
    %2 = vector.extract_strided_slice %1 {offsets = [0, 0], sizes = [28, 32], strides = [1, 1]} : vector<32x32xf32> to vector<28x32xf32>
    %c0_2 = arith.constant 0 : index
    %c0_3 = arith.constant 0 : index
    %c0_4 = arith.constant 0 : index
    %3 = vector.load %arg2[%c0_2, %c0_3, %c0_4] : memref<5x32x168xf32, #tpu.memory_space<vmem>>, vector<1x32x168xf32>
    %4 = vector.shape_cast %3 : vector<1x32x168xf32> to vector<32x168xf32>
    %cst = arith.constant dense<0.000000e+00> : vector<28x168xf32>
    %5 = tpu.matmul %2, %4, %cst {dimension_numbers = #tpu.dot_dimension_numbers<[1], [0], [0], [1], [0, 0, 1, 1], [], []>} : vector<28x32xf32>, vector<32x168xf32>, vector<28x168xf32> -> vector<28x168xf32>
    %6 = vector.extract_strided_slice %1 {offsets = [1, 0], sizes = [28, 32], strides = [1, 1]} : vector<32x32xf32> to vector<28x32xf32>
    %c1 = arith.constant 1 : index
    %c0_5 = arith.constant 0 : index
    %c0_6 = arith.constant 0 : index
    %7 = vector.load %arg2[%c1, %c0_5, %c0_6] : memref<5x32x168xf32, #tpu.memory_space<vmem>>, vector<1x32x168xf32>
    %8 = vector.shape_cast %7 : vector<1x32x168xf32> to vector<32x168xf32>
    %cst_7 = arith.constant dense<0.000000e+00> : vector<28x168xf32>
    %9 = tpu.matmul %6, %8, %cst_7 {dimension_numbers = #tpu.dot_dimension_numbers<[1], [0], [0], [1], [0, 0, 1, 1], [], []>} : vector<28x32xf32>, vector<32x168xf32>, vector<28x168xf32> -> vector<28x168xf32>
    %10 = arith.addf %5, %9 : vector<28x168xf32>
    %11 = vector.extract_strided_slice %1 {offsets = [2, 0], sizes = [28, 32], strides = [1, 1]} : vector<32x32xf32> to vector<28x32xf32>
    %c2 = arith.constant 2 : index
    %c0_8 = arith.constant 0 : index
    %c0_9 = arith.constant 0 : index
    %12 = vector.load %arg2[%c2, %c0_8, %c0_9] : memref<5x32x168xf32, #tpu.memory_space<vmem>>, vector<1x32x168xf32>
    %13 = vector.shape_cast %12 : vector<1x32x168xf32> to vector<32x168xf32>
    %cst_10 = arith.constant dense<0.000000e+00> : vector<28x168xf32>
    %14 = tpu.matmul %11, %13, %cst_10 {dimension_numbers = #tpu.dot_dimension_numbers<[1], [0], [0], [1], [0, 0, 1, 1], [], []>} : vector<28x32xf32>, vector<32x168xf32>, vector<28x168xf32> -> vector<28x168xf32>
    %15 = arith.addf %10, %14 : vector<28x168xf32>
    %16 = vector.extract_strided_slice %1 {offsets = [3, 0], sizes = [28, 32], strides = [1, 1]} : vector<32x32xf32> to vector<28x32xf32>
    %c3 = arith.constant 3 : index
    %c0_11 = arith.constant 0 : index
    %c0_12 = arith.constant 0 : index
    %17 = vector.load %arg2[%c3, %c0_11, %c0_12] : memref<5x32x168xf32, #tpu.memory_space<vmem>>, vector<1x32x168xf32>
    %18 = vector.shape_cast %17 : vector<1x32x168xf32> to vector<32x168xf32>
    %cst_13 = arith.constant dense<0.000000e+00> : vector<28x168xf32>
    %19 = tpu.matmul %16, %18, %cst_13 {dimension_numbers = #tpu.dot_dimension_numbers<[1], [0], [0], [1], [0, 0, 1, 1], [], []>} : vector<28x32xf32>, vector<32x168xf32>, vector<28x168xf32> -> vector<28x168xf32>
    %20 = arith.addf %15, %19 : vector<28x168xf32>
    %21 = vector.extract_strided_slice %1 {offsets = [4, 0], sizes = [28, 32], strides = [1, 1]} : vector<32x32xf32> to vector<28x32xf32>
    %c4 = arith.constant 4 : index
    %c0_14 = arith.constant 0 : index
    %c0_15 = arith.constant 0 : index
    %22 = vector.load %arg2[%c4, %c0_14, %c0_15] : memref<5x32x168xf32, #tpu.memory_space<vmem>>, vector<1x32x168xf32>
    %23 = vector.shape_cast %22 : vector<1x32x168xf32> to vector<32x168xf32>
    %cst_16 = arith.constant dense<0.000000e+00> : vector<28x168xf32>
    %24 = tpu.matmul %21, %23, %cst_16 {dimension_numbers = #tpu.dot_dimension_numbers<[1], [0], [0], [1], [0, 0, 1, 1], [], []>} : vector<28x32xf32>, vector<32x168xf32>, vector<28x168xf32> -> vector<28x168xf32>
    %25 = arith.addf %20, %24 : vector<28x168xf32>
    %c0_17 = arith.constant 0 : index
    %c0_18 = arith.constant 0 : index
    %26 = vector.load %arg3[%c0_17, %c0_18] : memref<1x168xf32, #tpu.memory_space<vmem>>, vector<1x168xf32>
    %27 = vector.broadcast %26 : vector<1x168xf32> to vector<28x168xf32>
    %28 = arith.mulf %25, %27 : vector<28x168xf32>
    %c0_19 = arith.constant 0 : index
    %c0_20 = arith.constant 0 : index
    %29 = vector.load %arg4[%c0_19, %c0_20] : memref<1x168xf32, #tpu.memory_space<vmem>>, vector<1x168xf32>
    %30 = vector.broadcast %29 : vector<1x168xf32> to vector<28x168xf32>
    %31 = arith.addf %28, %30 : vector<28x168xf32>
    %cst_21 = arith.constant 0.000000e+00 : f32
    %32 = vector.broadcast %cst_21 : f32 to vector<28x168xf32>
    %33 = arith.cmpf ogt, %31, %32 : vector<28x168xf32>
    %cst_22 = arith.constant 1.000000e-01 : f32
    %34 = vector.broadcast %cst_22 : f32 to vector<28x168xf32>
    %35 = arith.mulf %34, %31 : vector<28x168xf32>
    %36 = arith.select %33, %31, %35 : vector<28x168xi1>, vector<28x168xf32>
    %c0_23 = arith.constant 0 : index
    %c0_24 = arith.constant 0 : index
    %37 = vector.load %arg5[%c0_23, %c0_24] : memref<14x28xf32, #tpu.memory_space<vmem>>, vector<14x28xf32>
    %cst_25 = arith.constant dense<0.000000e+00> : vector<14x168xf32>
    %38 = tpu.matmul %37, %36, %cst_25 {dimension_numbers = #tpu.dot_dimension_numbers<[1], [0], [0], [1], [0, 0, 1, 1], [], []>} : vector<14x28xf32>, vector<28x168xf32>, vector<14x168xf32> -> vector<14x168xf32>
    %c0_26 = arith.constant 0 : index
    %c0_27 = arith.constant 0 : index
    %39 = vector.load %arg6[%c0_26, %c0_27] : memref<168x84xf32, #tpu.memory_space<vmem>>, vector<168x84xf32>
    %cst_28 = arith.constant dense<0.000000e+00> : vector<14x84xf32>
    %40 = tpu.matmul %38, %39, %cst_28 {dimension_numbers = #tpu.dot_dimension_numbers<[1], [0], [0], [1], [0, 0, 1, 1], [], []>} : vector<14x168xf32>, vector<168x84xf32>, vector<14x84xf32> -> vector<14x84xf32>
    %41 = vector.extract_strided_slice %40 {offsets = [0, 0], sizes = [10, 84], strides = [1, 1]} : vector<14x84xf32> to vector<10x84xf32>
    %c0_29 = arith.constant 0 : index
    %c0_30 = arith.constant 0 : index
    %c0_31 = arith.constant 0 : index
    %42 = vector.load %arg7[%c0_29, %c0_30, %c0_31] : memref<5x84x160xf32, #tpu.memory_space<vmem>>, vector<1x84x160xf32>
    %43 = vector.shape_cast %42 : vector<1x84x160xf32> to vector<84x160xf32>
    %cst_32 = arith.constant dense<0.000000e+00> : vector<10x160xf32>
    %44 = tpu.matmul %41, %43, %cst_32 {dimension_numbers = #tpu.dot_dimension_numbers<[1], [0], [0], [1], [0, 0, 1, 1], [], []>} : vector<10x84xf32>, vector<84x160xf32>, vector<10x160xf32> -> vector<10x160xf32>
    %45 = vector.extract_strided_slice %40 {offsets = [1, 0], sizes = [10, 84], strides = [1, 1]} : vector<14x84xf32> to vector<10x84xf32>
    %c1_33 = arith.constant 1 : index
    %c0_34 = arith.constant 0 : index
    %c0_35 = arith.constant 0 : index
    %46 = vector.load %arg7[%c1_33, %c0_34, %c0_35] : memref<5x84x160xf32, #tpu.memory_space<vmem>>, vector<1x84x160xf32>
    %47 = vector.shape_cast %46 : vector<1x84x160xf32> to vector<84x160xf32>
    %cst_36 = arith.constant dense<0.000000e+00> : vector<10x160xf32>
    %48 = tpu.matmul %45, %47, %cst_36 {dimension_numbers = #tpu.dot_dimension_numbers<[1], [0], [0], [1], [0, 0, 1, 1], [], []>} : vector<10x84xf32>, vector<84x160xf32>, vector<10x160xf32> -> vector<10x160xf32>
    %49 = arith.addf %44, %48 : vector<10x160xf32>
    %50 = vector.extract_strided_slice %40 {offsets = [2, 0], sizes = [10, 84], strides = [1, 1]} : vector<14x84xf32> to vector<10x84xf32>
    %c2_37 = arith.constant 2 : index
    %c0_38 = arith.constant 0 : index
    %c0_39 = arith.constant 0 : index
    %51 = vector.load %arg7[%c2_37, %c0_38, %c0_39] : memref<5x84x160xf32, #tpu.memory_space<vmem>>, vector<1x84x160xf32>
    %52 = vector.shape_cast %51 : vector<1x84x160xf32> to vector<84x160xf32>
    %cst_40 = arith.constant dense<0.000000e+00> : vector<10x160xf32>
    %53 = tpu.matmul %50, %52, %cst_40 {dimension_numbers = #tpu.dot_dimension_numbers<[1], [0], [0], [1], [0, 0, 1, 1], [], []>} : vector<10x84xf32>, vector<84x160xf32>, vector<10x160xf32> -> vector<10x160xf32>
    %54 = arith.addf %49, %53 : vector<10x160xf32>
    %55 = vector.extract_strided_slice %40 {offsets = [3, 0], sizes = [10, 84], strides = [1, 1]} : vector<14x84xf32> to vector<10x84xf32>
    %c3_41 = arith.constant 3 : index
    %c0_42 = arith.constant 0 : index
    %c0_43 = arith.constant 0 : index
    %56 = vector.load %arg7[%c3_41, %c0_42, %c0_43] : memref<5x84x160xf32, #tpu.memory_space<vmem>>, vector<1x84x160xf32>
    %57 = vector.shape_cast %56 : vector<1x84x160xf32> to vector<84x160xf32>
    %cst_44 = arith.constant dense<0.000000e+00> : vector<10x160xf32>
    %58 = tpu.matmul %55, %57, %cst_44 {dimension_numbers = #tpu.dot_dimension_numbers<[1], [0], [0], [1], [0, 0, 1, 1], [], []>} : vector<10x84xf32>, vector<84x160xf32>, vector<10x160xf32> -> vector<10x160xf32>
    %59 = arith.addf %54, %58 : vector<10x160xf32>
    %60 = vector.extract_strided_slice %40 {offsets = [4, 0], sizes = [10, 84], strides = [1, 1]} : vector<14x84xf32> to vector<10x84xf32>
    %c4_45 = arith.constant 4 : index
    %c0_46 = arith.constant 0 : index
    %c0_47 = arith.constant 0 : index
    %61 = vector.load %arg7[%c4_45, %c0_46, %c0_47] : memref<5x84x160xf32, #tpu.memory_space<vmem>>, vector<1x84x160xf32>
    %62 = vector.shape_cast %61 : vector<1x84x160xf32> to vector<84x160xf32>
    %cst_48 = arith.constant dense<0.000000e+00> : vector<10x160xf32>
    %63 = tpu.matmul %60, %62, %cst_48 {dimension_numbers = #tpu.dot_dimension_numbers<[1], [0], [0], [1], [0, 0, 1, 1], [], []>} : vector<10x84xf32>, vector<84x160xf32>, vector<10x160xf32> -> vector<10x160xf32>
    %64 = arith.addf %59, %63 : vector<10x160xf32>
    %c0_49 = arith.constant 0 : index
    %c0_50 = arith.constant 0 : index
    %65 = vector.load %arg8[%c0_49, %c0_50] : memref<1x160xf32, #tpu.memory_space<vmem>>, vector<1x160xf32>
    %66 = vector.broadcast %65 : vector<1x160xf32> to vector<10x160xf32>
    %67 = arith.mulf %64, %66 : vector<10x160xf32>
    %c0_51 = arith.constant 0 : index
    %c0_52 = arith.constant 0 : index
    %68 = vector.load %arg9[%c0_51, %c0_52] : memref<1x160xf32, #tpu.memory_space<vmem>>, vector<1x160xf32>
    %69 = vector.broadcast %68 : vector<1x160xf32> to vector<10x160xf32>
    %70 = arith.addf %67, %69 : vector<10x160xf32>
    %cst_53 = arith.constant 0.000000e+00 : f32
    %71 = vector.broadcast %cst_53 : f32 to vector<10x160xf32>
    %72 = arith.cmpf ogt, %70, %71 : vector<10x160xf32>
    %cst_54 = arith.constant 1.000000e-01 : f32
    %73 = vector.broadcast %cst_54 : f32 to vector<10x160xf32>
    %74 = arith.mulf %73, %70 : vector<10x160xf32>
    %75 = arith.select %72, %70, %74 : vector<10x160xi1>, vector<10x160xf32>
    %c0_55 = arith.constant 0 : index
    %c0_56 = arith.constant 0 : index
    %76 = vector.load %arg10[%c0_55, %c0_56] : memref<5x10xf32, #tpu.memory_space<vmem>>, vector<5x10xf32>
    %cst_57 = arith.constant dense<0.000000e+00> : vector<5x160xf32>
    %77 = tpu.matmul %76, %75, %cst_57 {dimension_numbers = #tpu.dot_dimension_numbers<[1], [0], [0], [1], [0, 0, 1, 1], [], []>} : vector<5x10xf32>, vector<10x160xf32>, vector<5x160xf32> -> vector<5x160xf32>
    %c0_58 = arith.constant 0 : index
    %c0_59 = arith.constant 0 : index
    %78 = vector.load %arg11[%c0_58, %c0_59] : memref<160x80xf32, #tpu.memory_space<vmem>>, vector<160x80xf32>
    %cst_60 = arith.constant dense<0.000000e+00> : vector<5x80xf32>
    %79 = tpu.matmul %77, %78, %cst_60 {dimension_numbers = #tpu.dot_dimension_numbers<[1], [0], [0], [1], [0, 0, 1, 1], [], []>} : vector<5x160xf32>, vector<160x80xf32>, vector<5x80xf32> -> vector<5x80xf32>
    %80 = vector.extract_strided_slice %79 {offsets = [0, 0], sizes = [1, 80], strides = [1, 1]} : vector<5x80xf32> to vector<1x80xf32>
    %c0_61 = arith.constant 0 : index
    %c0_62 = arith.constant 0 : index
    %c0_63 = arith.constant 0 : index
    %81 = vector.load %arg12[%c0_61, %c0_62, %c0_63] : memref<5x80x120xf32, #tpu.memory_space<vmem>>, vector<1x80x120xf32>
    %82 = vector.shape_cast %81 : vector<1x80x120xf32> to vector<80x120xf32>
    %cst_64 = arith.constant dense<0.000000e+00> : vector<1x120xf32>
    %83 = tpu.matmul %80, %82, %cst_64 {dimension_numbers = #tpu.dot_dimension_numbers<[1], [0], [0], [1], [0, 0, 1, 1], [], []>} : vector<1x80xf32>, vector<80x120xf32>, vector<1x120xf32> -> vector<1x120xf32>
    %84 = vector.extract_strided_slice %79 {offsets = [1, 0], sizes = [1, 80], strides = [1, 1]} : vector<5x80xf32> to vector<1x80xf32>
    %c1_65 = arith.constant 1 : index
    %c0_66 = arith.constant 0 : index
    %c0_67 = arith.constant 0 : index
    %85 = vector.load %arg12[%c1_65, %c0_66, %c0_67] : memref<5x80x120xf32, #tpu.memory_space<vmem>>, vector<1x80x120xf32>
    %86 = vector.shape_cast %85 : vector<1x80x120xf32> to vector<80x120xf32>
    %cst_68 = arith.constant dense<0.000000e+00> : vector<1x120xf32>
    %87 = tpu.matmul %84, %86, %cst_68 {dimension_numbers = #tpu.dot_dimension_numbers<[1], [0], [0], [1], [0, 0, 1, 1], [], []>} : vector<1x80xf32>, vector<80x120xf32>, vector<1x120xf32> -> vector<1x120xf32>
    %88 = arith.addf %83, %87 : vector<1x120xf32>
    %89 = vector.extract_strided_slice %79 {offsets = [2, 0], sizes = [1, 80], strides = [1, 1]} : vector<5x80xf32> to vector<1x80xf32>
    %c2_69 = arith.constant 2 : index
    %c0_70 = arith.constant 0 : index
    %c0_71 = arith.constant 0 : index
    %90 = vector.load %arg12[%c2_69, %c0_70, %c0_71] : memref<5x80x120xf32, #tpu.memory_space<vmem>>, vector<1x80x120xf32>
    %91 = vector.shape_cast %90 : vector<1x80x120xf32> to vector<80x120xf32>
    %cst_72 = arith.constant dense<0.000000e+00> : vector<1x120xf32>
    %92 = tpu.matmul %89, %91, %cst_72 {dimension_numbers = #tpu.dot_dimension_numbers<[1], [0], [0], [1], [0, 0, 1, 1], [], []>} : vector<1x80xf32>, vector<80x120xf32>, vector<1x120xf32> -> vector<1x120xf32>
    %93 = arith.addf %88, %92 : vector<1x120xf32>
    %94 = vector.extract_strided_slice %79 {offsets = [3, 0], sizes = [1, 80], strides = [1, 1]} : vector<5x80xf32> to vector<1x80xf32>
    %c3_73 = arith.constant 3 : index
    %c0_74 = arith.constant 0 : index
    %c0_75 = arith.constant 0 : index
    %95 = vector.load %arg12[%c3_73, %c0_74, %c0_75] : memref<5x80x120xf32, #tpu.memory_space<vmem>>, vector<1x80x120xf32>
    %96 = vector.shape_cast %95 : vector<1x80x120xf32> to vector<80x120xf32>
    %cst_76 = arith.constant dense<0.000000e+00> : vector<1x120xf32>
    %97 = tpu.matmul %94, %96, %cst_76 {dimension_numbers = #tpu.dot_dimension_numbers<[1], [0], [0], [1], [0, 0, 1, 1], [], []>} : vector<1x80xf32>, vector<80x120xf32>, vector<1x120xf32> -> vector<1x120xf32>
    %98 = arith.addf %93, %97 : vector<1x120xf32>
    %99 = vector.extract_strided_slice %79 {offsets = [4, 0], sizes = [1, 80], strides = [1, 1]} : vector<5x80xf32> to vector<1x80xf32>
    %c4_77 = arith.constant 4 : index
    %c0_78 = arith.constant 0 : index
    %c0_79 = arith.constant 0 : index
    %100 = vector.load %arg12[%c4_77, %c0_78, %c0_79] : memref<5x80x120xf32, #tpu.memory_space<vmem>>, vector<1x80x120xf32>
    %101 = vector.shape_cast %100 : vector<1x80x120xf32> to vector<80x120xf32>
    %cst_80 = arith.constant dense<0.000000e+00> : vector<1x120xf32>
    %102 = tpu.matmul %99, %101, %cst_80 {dimension_numbers = #tpu.dot_dimension_numbers<[1], [0], [0], [1], [0, 0, 1, 1], [], []>} : vector<1x80xf32>, vector<80x120xf32>, vector<1x120xf32> -> vector<1x120xf32>
    %103 = arith.addf %98, %102 : vector<1x120xf32>
    %c0_81 = arith.constant 0 : index
    %c0_82 = arith.constant 0 : index
    %104 = vector.load %arg13[%c0_81, %c0_82] : memref<1x120xf32, #tpu.memory_space<vmem>>, vector<1x120xf32>
    %105 = arith.mulf %103, %104 : vector<1x120xf32>
    %c0_83 = arith.constant 0 : index
    %c0_84 = arith.constant 0 : index
    %106 = vector.load %arg14[%c0_83, %c0_84] : memref<1x120xf32, #tpu.memory_space<vmem>>, vector<1x120xf32>
    %107 = arith.addf %105, %106 : vector<1x120xf32>
    %cst_85 = arith.constant 0.000000e+00 : f32
    %108 = vector.broadcast %cst_85 : f32 to vector<1x120xf32>
    %109 = arith.cmpf ogt, %107, %108 : vector<1x120xf32>
    %cst_86 = arith.constant 1.000000e-01 : f32
    %110 = vector.broadcast %cst_86 : f32 to vector<1x120xf32>
    %111 = arith.mulf %110, %107 : vector<1x120xf32>
    %112 = arith.select %109, %107, %111 : vector<1x120xi1>, vector<1x120xf32>
    %c0_87 = arith.constant 0 : index
    %c0_88 = arith.constant 0 : index
    %113 = vector.load %arg15[%c0_87, %c0_88] : memref<120x84xf32, #tpu.memory_space<vmem>>, vector<120x84xf32>
    %cst_89 = arith.constant dense<0.000000e+00> : vector<1x84xf32>
    %114 = tpu.matmul %112, %113, %cst_89 {dimension_numbers = #tpu.dot_dimension_numbers<[1], [0], [0], [1], [0, 0, 1, 1], [], []>} : vector<1x120xf32>, vector<120x84xf32>, vector<1x84xf32> -> vector<1x84xf32>
    %c0_90 = arith.constant 0 : index
    %c0_91 = arith.constant 0 : index
    %115 = vector.load %arg16[%c0_90, %c0_91] : memref<1x84xf32, #tpu.memory_space<vmem>>, vector<1x84xf32>
    %116 = arith.addf %114, %115 : vector<1x84xf32>
    %cst_92 = arith.constant 0.000000e+00 : f32
    %117 = vector.broadcast %cst_92 : f32 to vector<1x84xf32>
    %118 = arith.cmpf ogt, %116, %117 : vector<1x84xf32>
    %cst_93 = arith.constant 1.000000e-01 : f32
    %119 = vector.broadcast %cst_93 : f32 to vector<1x84xf32>
    %120 = arith.mulf %119, %116 : vector<1x84xf32>
    %121 = arith.select %118, %116, %120 : vector<1x84xi1>, vector<1x84xf32>
    %c0_94 = arith.constant 0 : index
    %c0_95 = arith.constant 0 : index
    %122 = vector.load %arg17[%c0_94, %c0_95] : memref<84x10xf32, #tpu.memory_space<vmem>>, vector<84x10xf32>
    %cst_96 = arith.constant dense<0.000000e+00> : vector<1x10xf32>
    %123 = tpu.matmul %121, %122, %cst_96 {dimension_numbers = #tpu.dot_dimension_numbers<[1], [0], [0], [1], [0, 0, 1, 1], [], []>} : vector<1x84xf32>, vector<84x10xf32>, vector<1x10xf32> -> vector<1x10xf32>
    %c0_97 = arith.constant 0 : index
    %c0_98 = arith.constant 0 : index
    %124 = vector.load %arg18[%c0_97, %c0_98] : memref<1x10xf32, #tpu.memory_space<vmem>>, vector<1x10xf32>
    %125 = arith.addf %123, %124 : vector<1x10xf32>
    %cst_99 = arith.constant dense<0xFF800000> : vector<1xf32>
    %126 = vector.multi_reduction <maximumf>, %125, %cst_99 [1] : vector<1x10xf32> to vector<1xf32>
    %127 = vector.shape_cast %126 : vector<1xf32> to vector<1x1xf32>
    %128 = vector.broadcast %127 : vector<1x1xf32> to vector<1x10xf32>
    %129 = arith.subf %125, %128 : vector<1x10xf32>
    %130 = math.exp %129 : vector<1x10xf32>
    %cst_100 = arith.constant dense<0.000000e+00> : vector<1xf32>
    %131 = vector.multi_reduction <add>, %130, %cst_100 [1] : vector<1x10xf32> to vector<1xf32>
    %132 = vector.shape_cast %131 : vector<1xf32> to vector<1x1xf32>
    %133 = vector.broadcast %132 : vector<1x1xf32> to vector<1x10xf32>
    %134 = arith.divf %130, %133 : vector<1x10xf32>
    %c0_101 = arith.constant 0 : index
    %c0_102 = arith.constant 0 : index
    %c0_103 = arith.constant 0 : index
    %135 = vector.load %arg19[%c0_101, %c0_102, %c0_103] : memref<1x1x10xf32, #tpu.memory_space<vmem>>, vector<1x1x10xf32>
    %136 = vector.shape_cast %135 : vector<1x1x10xf32> to vector<1x10xf32>
    %137 = vector.shape_cast %134 : vector<1x10xf32> to vector<1x1x10xf32>
    tpu.vector_store %arg19[%c0_101, %c0_102, %c0_103], %137 {strides = array<i32>} : memref<1x1x10xf32, #tpu.memory_space<vmem>>, vector<1x1x10xf32>,
    %cst_104 = arith.constant dense<0xFF800000> : vector<1xf32>
    %138 = vector.multi_reduction <maximumf>, %134, %cst_104 [1] : vector<1x10xf32> to vector<1xf32>
    %139 = vector.shape_cast %138 : vector<1xf32> to vector<1x1xf32>
    %140 = tpu.iota {dimensions = array<i32: 1>} : vector<1x10xi32>
    %141 = vector.broadcast %139 : vector<1x1xf32> to vector<1x10xf32>
    %142 = arith.cmpf oge, %134, %141 : vector<1x10xf32>
    %c10_i32 = arith.constant 10 : i32
    %143 = vector.broadcast %c10_i32 : i32 to vector<1x10xi32>
    %144 = arith.select %142, %140, %143 : vector<1x10xi1>, vector<1x10xi32>
    %cst_105 = arith.constant dense<2147483647> : vector<1xi32>
    %145 = vector.multi_reduction <minsi>, %144, %cst_105 [1] : vector<1x10xi32> to vector<1xi32>
    %146 = vector.shape_cast %145 : vector<1xi32> to vector<1x1xi32>
    %c0_106 = arith.constant 0 : index
    %c0_107 = arith.constant 0 : index
    %c0_108 = arith.constant 0 : index
    %147 = vector.load %arg20[%c0_106, %c0_107, %c0_108] : memref<1x1x1xi32, #tpu.memory_space<vmem>>, vector<1x1x1xi32>
    %148 = vector.shape_cast %147 : vector<1x1x1xi32> to vector<1x1xi32>
    %149 = vector.shape_cast %146 : vector<1x1xi32> to vector<1x1x1xi32>
    tpu.vector_store %arg20[%c0_106, %c0_107, %c0_108], %149 {strides = array<i32>} : memref<1x1x1xi32, #tpu.memory_space<vmem>>, vector<1x1x1xi32>,
    return
  }
  func.func @transform_0(%arg0: i32) -> (i32, i32, i32) {
    %c0_i32 = arith.constant 0 : i32
    %c0_i32_0 = arith.constant 0 : i32
    %c0_i32_1 = arith.constant 0 : i32
    return %arg0, %c0_i32, %c0_i32_0 : i32, i32, i32
  }
  func.func @transform_1(%arg0: i32) -> (i32, i32, i32) {
    %c0_i32 = arith.constant 0 : i32
    %c0_i32_0 = arith.constant 0 : i32
    %c0_i32_1 = arith.constant 0 : i32
    %c0_i32_2 = arith.constant 0 : i32
    return %c0_i32, %c0_i32_0, %c0_i32_1 : i32, i32, i32
  }
  func.func @transform_2(%arg0: i32) -> (i32, i32) {
    %c0_i32 = arith.constant 0 : i32
    %c0_i32_0 = arith.constant 0 : i32
    %c0_i32_1 = arith.constant 0 : i32
    return %c0_i32, %c0_i32_0 : i32, i32
  }
  func.func @transform_3(%arg0: i32) -> (i32, i32) {
    %c0_i32 = arith.constant 0 : i32
    %c0_i32_0 = arith.constant 0 : i32
    %c0_i32_1 = arith.constant 0 : i32
    return %c0_i32, %c0_i32_0 : i32, i32
  }
  func.func @transform_4(%arg0: i32) -> (i32, i32) {
    %c0_i32 = arith.constant 0 : i32
    %c0_i32_0 = arith.constant 0 : i32
    %c0_i32_1 = arith.constant 0 : i32
    return %c0_i32, %c0_i32_0 : i32, i32
  }
  func.func @transform_5(%arg0: i32) -> (i32, i32) {
    %c0_i32 = arith.constant 0 : i32
    %c0_i32_0 = arith.constant 0 : i32
    %c0_i32_1 = arith.constant 0 : i32
    return %c0_i32, %c0_i32_0 : i32, i32
  }
  func.func @transform_6(%arg0: i32) -> (i32, i32, i32) {
    %c0_i32 = arith.constant 0 : i32
    %c0_i32_0 = arith.constant 0 : i32
    %c0_i32_1 = arith.constant 0 : i32
    %c0_i32_2 = arith.constant 0 : i32
    return %c0_i32, %c0_i32_0, %c0_i32_1 : i32, i32, i32
  }
  func.func @transform_7(%arg0: i32) -> (i32, i32) {
    %c0_i32 = arith.constant 0 : i32
    %c0_i32_0 = arith.constant 0 : i32
    %c0_i32_1 = arith.constant 0 : i32
    return %c0_i32, %c0_i32_0 : i32, i32
  }
  func.func @transform_8(%arg0: i32) -> (i32, i32) {
    %c0_i32 = arith.constant 0 : i32
    %c0_i32_0 = arith.constant 0 : i32
    %c0_i32_1 = arith.constant 0 : i32
    return %c0_i32, %c0_i32_0 : i32, i32
  }
  func.func @transform_9(%arg0: i32) -> (i32, i32) {
    %c0_i32 = arith.constant 0 : i32
    %c0_i32_0 = arith.constant 0 : i32
    %c0_i32_1 = arith.constant 0 : i32
    return %c0_i32, %c0_i32_0 : i32, i32
  }
  func.func @transform_10(%arg0: i32) -> (i32, i32) {
    %c0_i32 = arith.constant 0 : i32
    %c0_i32_0 = arith.constant 0 : i32
    %c0_i32_1 = arith.constant 0 : i32
    return %c0_i32, %c0_i32_0 : i32, i32
  }
  func.func @transform_11(%arg0: i32) -> (i32, i32, i32) {
    %c0_i32 = arith.constant 0 : i32
    %c0_i32_0 = arith.constant 0 : i32
    %c0_i32_1 = arith.constant 0 : i32
    %c0_i32_2 = arith.constant 0 : i32
    return %c0_i32, %c0_i32_0, %c0_i32_1 : i32, i32, i32
  }
  func.func @transform_12(%arg0: i32) -> (i32, i32) {
    %c0_i32 = arith.constant 0 : i32
    %c0_i32_0 = arith.constant 0 : i32
    %c0_i32_1 = arith.constant 0 : i32
    return %c0_i32, %c0_i32_0 : i32, i32
  }
  func.func @transform_13(%arg0: i32) -> (i32, i32) {
    %c0_i32 = arith.constant 0 : i32
    %c0_i32_0 = arith.constant 0 : i32
    %c0_i32_1 = arith.constant 0 : i32
    return %c0_i32, %c0_i32_0 : i32, i32
  }
  func.func @transform_14(%arg0: i32) -> (i32, i32) {
    %c0_i32 = arith.constant 0 : i32
    %c0_i32_0 = arith.constant 0 : i32
    %c0_i32_1 = arith.constant 0 : i32
    return %c0_i32, %c0_i32_0 : i32, i32
  }
  func.func @transform_15(%arg0: i32) -> (i32, i32) {
    %c0_i32 = arith.constant 0 : i32
    %c0_i32_0 = arith.constant 0 : i32
    %c0_i32_1 = arith.constant 0 : i32
    return %c0_i32, %c0_i32_0 : i32, i32
  }
  func.func @transform_16(%arg0: i32) -> (i32, i32) {
    %c0_i32 = arith.constant 0 : i32
    %c0_i32_0 = arith.constant 0 : i32
    %c0_i32_1 = arith.constant 0 : i32
    return %c0_i32, %c0_i32_0 : i32, i32
  }
  func.func @transform_17(%arg0: i32) -> (i32, i32) {
    %c0_i32 = arith.constant 0 : i32
    %c0_i32_0 = arith.constant 0 : i32
    %c0_i32_1 = arith.constant 0 : i32
    return %c0_i32, %c0_i32_0 : i32, i32
  }
  func.func @transform_18(%arg0: i32) -> (i32, i32, i32) {
    %c0_i32 = arith.constant 0 : i32
    %c0_i32_0 = arith.constant 0 : i32
    %c0_i32_1 = arith.constant 0 : i32
    return %arg0, %c0_i32, %c0_i32_0 : i32, i32, i32
  }
  func.func @transform_19(%arg0: i32) -> (i32, i32, i32) {
    %c0_i32 = arith.constant 0 : i32
    %c0_i32_0 = arith.constant 0 : i32
    %c0_i32_1 = arith.constant 0 : i32
    return %arg0, %c0_i32, %c0_i32_0 : i32, i32, i32
  }
}

</mosaic_0001>

<bundles_post_ra>
// kernel: tpu_custom_call.1
= control target key start
LH: loop header
LB: loop body
LE: loop exit
PB: predicated region body
PF: predicated region fallthrough
CT: control target
= control target key end

     0   :  { %s5292_s0 = inlined_call_operand.vmem [shape: f32[2,32,32], index: 0, kind: input, shape index: {}]   ;;  %s5293_s1 = inlined_call_operand.vmem [shape: f32[5,32,168], index: 1, kind: input, shape index: {}]   ;;  %s5294_s2 = inlined_call_operand.vmem [shape: f32[1,168], index: 2, kind: input, shape index: {}]   ;;  %s5295_s3 = inlined_call_operand.vmem [shape: f32[1,168], index: 3, kind: input, shape index: {}]   ;;  %s5296_s4 = inlined_call_operand.vmem [shape: f32[14,28], index: 4, kind: input, shape index: {}]   ;;  %s5297_s5 = inlined_call_operand.vmem [shape: f32[168,84], index: 5, kind: input, shape index: {}]   ;;  %s5298_s6 = inlined_call_operand.vmem [shape: f32[5,84,160], index: 6, kind: input, shape index: {}]   ;;  %s5299_s7 = inlined_call_operand.vmem [shape: f32[1,160], index: 7, kind: input, shape index: {}]   ;;  %s5300_s8 = inlined_call_operand.vmem [shape: f32[1,160], index: 8, kind: input, shape index: {}]   ;;  %s5301_s9 = inlined_call_operand.vmem [shape: f32[5,10], index: 9, kind: input, shape index: {}]   ;;  %s5302_s10 = inlined_call_operand.vmem [shape: f32[160,80], index: 10, kind: input, shape index: {}]   ;;  %s5303_s11 = inlined_call_operand.vmem [shape: f32[5,80,120], index: 11, kind: input, shape index: {}]   ;;  %s5304_s12 = inlined_call_operand.vmem [shape: f32[1,120], index: 12, kind: input, shape index: {}]   ;;  %s5305_s13 = inlined_call_operand.vmem [shape: f32[1,120], index: 13, kind: input, shape index: {}]   ;;  %s5306_s14 = inlined_call_operand.vmem [shape: f32[120,84], index: 14, kind: input, shape index: {}]   ;;  %s5307_s15 = inlined_call_operand.vmem [shape: f32[1,84], index: 15, kind: input, shape index: {}]   ;;  %s5308_s16 = inlined_call_operand.vmem [shape: f32[84,10], index: 16, kind: input, shape index: {}]   ;;  %s5309_s17 = inlined_call_operand.vmem [shape: f32[1,10], index: 17, kind: input, shape index: {}]   ;;  %s5310_s18 = inlined_call_operand.hbm [shape: f32[2,1,10], index: 18, kind: output, shape index: {0}]   ;;  %s5311_s19 = inlined_call_operand.vmem [shape: s32[2,1,1], index: 19, kind: output, shape index: {1}]  }
   0x1   :  { %5319 = sst [smem:[#allocation11_spill]] %s5292_s0 }
   0x2   :  { %5320 = sst [smem:[#allocation12_spill]] %s5293_s1 }
   0x3   :  { %5321 = sst [smem:[#allocation13_spill]] %s5294_s2 }
   0x4   :  { %5322 = sst [smem:[#allocation14_spill]] %s5295_s3 }
   0x5   :  { %5323 = sst [smem:[#allocation15_spill]] %s5296_s4 }
   0x6   :  { %5324 = sst [smem:[#allocation16_spill]] %s5311_s19 }
   0x7   :  { %25 = vsyncpa [#allocation3], 0 }
   0x8   :  { %27 = vsyncpa [#allocation3 + $0x1], 0  ;;  %s4086_s0 = smov 0   ;;  %s4088_s30 = smov 0  }
   0x9   :  { %s4090_s20 = smov 0   ;;  %s4092_s21 = smov 0  }
   0xa LB: > { %5325 = sst [smem:[#allocation5_spill]] %s3967_s0  ;;  %s4107_s1 = sadd.s32 4294967295, %s3979_s21   ;;  %s3979_s21 = sphi %s4092_s21, %s5342_s21   ;;  %s3975_s20 = sphi %s4090_s20, %s5344_s20   ;;  %s3971_s30 = sphi %s4088_s30, %s5346_s30   ;;  %s3967_s0 = sphi %s4086_s0, %s5345_s0  }
   0xb   : > { %5326 = sst [smem:[#allocation6_spill]] %s3975_s20  ;;  %s2999_s22 = sadd.s32 4294967294, %s3979_s21  }
   0xc   : > { %5327 = sst [smem:[#allocation7_spill]] %s3979_s21  ;;  %s4111_s2 = sadd.s32 1, %s3979_s21  }
   0xd   : > { %5328 = sst [smem:[#allocation8_spill]] %s4111_s2  ;;  %s423_s23 = sadd.s32 1, %s3975_s20 }
   0xe   : > { %s420_s24 = ssub.s32 %s3979_s21, %s4111_s2  ;;  %p433_p0 = scmp.ne.s32.totalorder %s3975_s20, %s3971_s30 }
   0xf   : > { %p421_p1 = scmp.eq.s32.totalorder %s420_s24, 0  ;;  %p434_p2 = scmp.eq.s32.totalorder %s4107_s1, 1 }
  0x10   : > { %p439_p3 = scmp.ne.s32.totalorder %s3971_s30, %s3967_s0  ;;  %p440_p4 = scmp.eq.s32.totalorder %s2999_s22, 1 }
  0x11   : > { %s4122_s25 = scalar_select %p421_p1, %s3975_s20, %s423_s23  }
  0x12   : > { %p4124_p5 = por %p434_p2, %p433_p0  ;;  %p4128_p6 = por %p440_p4, %p439_p3 }
  0x13   : > { %5329 = sst [smem:[#allocation9_spill]] %s4122_s25  ;;  %p3002_p7 = scmp.ge.s32.totalorder %s3979_s21, 1 }
  0x14   : > { %s5331_s26 = scalar_select %p4128_p6, 1, 0 }
  0x15   : > { %p543_p8 = scmp.lt.s32.totalorder %s3979_s21, 3 }
  0x16   : > { %5332 = sst [smem:[#allocation10_spill]] %s5331_s26 }
  0x17   : > { %p544_p9 = pnand %p3002_p7, %p543_p8 }
  0x18   : > { %s5333_s29 = sld [smem:[#allocation12_spill]] (!%p544_p9)  ;;  %p601_p10 = scmp.lt.s32.totalorder (!%p544_p9), %s4107_s1, 1  ;;  %v3981_v7 = vmov (!%p544_p9), 0.0   ;;  %vm634_vm0 = vcmask (!%p544_p9), 1046528   ;;  %vm642_vm1 = vcmask (!%p544_p9), 261120   ;;  %vm846_vm2 = vcmask (!%p544_p9), 1045504  }
  0x19   : > { %547 = sbr.rel (%p544_p9) target bundleno = 3001 (0xbb9), region = 92  ;;  %715 = vmatprep.mubr.f32.mxu0 (!%p544_p9), %v3981_v7  ;;  %727 = vmatprep.mubr.f32.mxu1 (!%p544_p9), %v3981_v7  ;;  %s5334_s26 = sld [smem:[#allocation11_spill]] (!%p544_p9)  ;;  %vm968_vm3 = vcmask (!%p544_p9), 1044480   ;;  %vm1090_vm4 = vcmask (!%p544_p9), 1043456   ;;  %vm3982_vm13 = vmmov (!%p544_p9), 1   ;;  %vm1269_vm15 = vcmask (!%p544_p9), 228352  }
  0x1a   : > { %s5335_s19 = sld [smem:[#allocation13_spill]] (!%p544_p9)  ;;  %s5336_s20 = sld [smem:[#allocation14_spill]] (!%p544_p9)  ;;  %vm3528_vm14 = vmpackc.low (!%p544_p9), %vm1090_vm4, %vm3982_vm13 }
  0x1b   : > { %s5337_s4 = sld [smem:[#allocation15_spill]] (!%p544_p9)  ;;  %s3985_s21 = smov (!%p544_p9), [#allocation2]  }
  0x1e   : > { %v3006_v0 = vld [vmem:[%s5333_s29 + $0x48] sm:$0xff] (!%p544_p9)  ;;  %v3008_v1 = vld [vmem:[%s5333_s29 + $0x58] sm:$0xff] (!%p544_p9)  ;;  %v3005_v2 = vld [vmem:[%s5333_s29 + $0x40] sm:$0xff] (!%p544_p9) }
  0x1f   : > { %v3483_v3 = vpack.c.bf16 (!%p544_p9), %v3008_v1, %v3006_v0  ;;  %v3007_v4 = vld [vmem:[%s5333_s29 + $0x50] sm:$0xff] (!%p544_p9)  ;;  %v3010_v5 = vld [vmem:[%s5333_s29 + $0x68] sm:$0xff] (!%p544_p9)  ;;  %v3012_v6 = vld [vmem:[%s5333_s29 + $0x78] sm:$0xff] (!%p544_p9) }
  0x20   : > { %v3485_v8 = vpack.c.bf16 %v3007_v4, %v3005_v2  ;;  %v3487_v9 = vpack.c.bf16 %v3012_v6, %v3010_v5  ;;  %v3009_v10 = vld [vmem:[%s5333_s29 + $0x60] sm:$0xff]  ;;  %v3011_v11 = vld [vmem:[%s5333_s29 + $0x70] sm:$0xff]  ;;  %s4162_s0 = scalar_select %p601_p10, %s4107_s1, 1  ;;  %v614_v12 = vld [vmem:[%s5333_s29 + $0x8] sm:$0xff] }
  0x21   : > { %3484 = vmatprep.subr.bf16.mxu0 %v3483_v3  ;;  %v616_v13 = vld [vmem:[%s5333_s29 + $0x18] sm:$0xff]  ;;  %3810 = vmatprep.subr.bf16.mxu1 %v3483_v3  ;;  %v3489_v14 = vpack.c.bf16 %v3011_v11, %v3009_v10  ;;  %v613_v15 = vld [vmem:[%s5333_s29] sm:$0xff]  ;;  %v615_v17 = vld [vmem:[%s5333_s29 + $0x10] sm:$0xff] }
  0x22   : > { %3486 = vmatpush1.bf16.msra.mxu0 %v3485_v8  ;;  %s3226_s28 = sshll.u32 %s4162_s0, 5  ;;  %3812 = vmatpush1.bf16.msra.mxu1 %v3485_v8  ;;  %v3491_v16 = vpack.c.bf16 %v616_v13, %v614_v12  ;;  %v618_v18 = vld [vmem:[%s5333_s29 + $0x28] sm:$0xff]  ;;  %v620_v19 = vld [vmem:[%s5333_s29 + $0x38] sm:$0xff]  ;;  %v3493_v25 = vpack.c.bf16 %v615_v17, %v613_v15  ;;  %v617_v29 = vld [vmem:[%s5333_s29 + $0x20] sm:$0xff] }
  0x23   : > { %3488 = vmatprep.subr.bf16.mxu0 %v3487_v9  ;;  %s4177_s23 = scalar_lea.vmem %s5334_s26, %s3226_s28  ;;  %3811 = vmatprep.subr.bf16.mxu1 %v3487_v9  ;;  %v3495_v28 = vpack.c.bf16 %v620_v19, %v618_v18  ;;  %v619_v30 = vld [vmem:[%s5333_s29 + $0x30] sm:$0xff]  ;;  %v3022_v31 = vld [vmem:[%s5333_s29 + $0x88] sm:$0xff]  ;;  %v3024_v32 = vld [vmem:[%s5333_s29 + $0x98] sm:$0xff]  ;;  %s3223_s26 = sshll.u32 %s4107_s1, 4 }
  0x24   : > { %v4189_v20 = vld [vmem:[%s4177_s23] sm:$0xff]  ;;  %v4192_v21 = vld [vmem:[%s4177_s23 + $0x8] sm:$0xff]  ;;  %v4195_v22 = vld [vmem:[%s4177_s23 + $0x10] sm:$0xff]  ;;  %v3497_v34 = vpack.c.bf16 %v619_v30, %v617_v29  ;;  %v3499_v35 = vpack.c.bf16 %v3024_v32, %v3022_v31  ;;  %s5252_s25 = scalar_lea.hbm %s5310_s18, %s3223_s26  ;;  %s3921_s28 = sshll.u32 %s3985_s21, 4  ;;  %s3922_s28 = int_to_ptr.vmem [resolvable:$false] %s3921_s28 }
  0x25   : > { %v635_v23 = vrot.slane %v4189_v20, 1  ;;  %v636_v24 = vrot.slane %v4192_v21, 1  ;;  %v638_v26 = vrot.slane %v4195_v22, 1  ;;  %v3021_v36 = vld [vmem:[%s5333_s29 + $0x80] sm:$0xff]  ;;  %v3023_v37 = vld [vmem:[%s5333_s29 + $0x90] sm:$0xff]  ;;  %v4223_v38 = vld [vmem:[%s4177_s23 + $0x18] sm:$0xff] }
  0x26   : > { %3490 = vmatpush1.bf16.msra.mxu0 %v3489_v14  ;;  %3813 = vmatpush1.bf16.msra.mxu1 %v3489_v14  ;;  %v3026_v39 = vld [vmem:[%s5333_s29 + $0xa8] sm:$0xff]  ;;  %v3028_v40 = vld [vmem:[%s5333_s29 + $0xb8] sm:$0xff]  ;;  %v640_v41 = vrot.slane %v4223_v38, 1  ;;  %v3501_v42 = vpack.c.bf16 %v3023_v37, %v3021_v36  ;;  %v3025_v44 = vld [vmem:[%s5333_s29 + $0xa0] sm:$0xff]  ;;  %v847_v51 = vrot.slane %v4189_v20, 2  ;;  %v848_v52 = vrot.slane %v4192_v21, 2 }
  0x27   : > { %v637_v27 = vsel %vm634_vm0, %v635_v23, %v636_v24  ;;  %3492 = vmatprep.subr.bf16.mxu0 %v3491_v16  ;;  %v639_v33 = vsel %vm634_vm0, %v636_v24, %v638_v26  ;;  %v3503_v43 = vpack.c.bf16 %v3028_v40, %v3026_v39  ;;  %v3027_v45 = vld [vmem:[%s5333_s29 + $0xb0] sm:$0xff]  ;;  %v3034_v47 = vld [vmem:[%s5333_s29 + $0xc8] sm:$0xff]  ;;  %v3036_v48 = vld [vmem:[%s5333_s29 + $0xd8] sm:$0xff]  ;;  %v850_v58 = vrot.slane %v4195_v22, 2 }
  0x28   : > { %v641_v46 = vsel %vm634_vm0, %v638_v26, %v640_v41  ;;  %v3505_v49 = vpack.c.bf16 %v3027_v45, %v3025_v44  ;;  %v3507_v50 = vpack.c.bf16 %v3036_v48, %v3034_v47  ;;  %v3033_v53 = vld [vmem:[%s5333_s29 + $0xc0] sm:$0xff]  ;;  %v3035_v54 = vld [vmem:[%s5333_s29 + $0xd0] sm:$0xff]  ;;  %v3038_v55 = vld [vmem:[%s5333_s29 + $0xe8] sm:$0xff]  ;;  %v849_v57 = vsel %vm846_vm2, %v847_v51, %v848_v52 }
  0x29   : > { %3013 = vmatmul.mubr.msk.f32.vlgmr.msra.gmra.mrb[0].mxu0 %vm642_vm1, %v637_v27  ;;  %3015 = vmatmul.mubr.msk.f32.vlgmr.msra.gmra.mrb[0].mxu1 %vm642_vm1, %v641_v46  ;;  %v3040_v56 = vld [vmem:[%s5333_s29 + $0xf8] sm:$0xff]  ;;  %v3509_v59 = vpack.c.bf16 %v3035_v54, %v3033_v53  ;;  %v3037_v61 = vld [vmem:[%s5333_s29 + $0xe0] sm:$0xff]  ;;  %v3039_v62 = vld [vmem:[%s5333_s29 + $0xf0] sm:$0xff]  ;;  %v851_v1 = vsel %vm846_vm2, %v848_v52, %v850_v58  ;;  %v852_v2 = vrot.slane %v4223_v38, 2  ;;  %v969_v6 = vrot.slane %v4189_v20, 3 }
  0x2a   : > { %3494 = vmatpush1.bf16.msra.mxu0 %v3493_v25  ;;  %721 = vmatprep.mubr.f32.mxu0 %v3981_v7  ;;  %v3511_v60 = vpack.c.bf16 %v3040_v56, %v3038_v55  ;;  %v3046_v63 = vld [vmem:[%s5333_s29 + $0x108] sm:$0xff]  ;;  %v3048_v0 = vld [vmem:[%s5333_s29 + $0x118] sm:$0xff]  ;;  %v3513_v3 = vpack.c.bf16 %v3039_v62, %v3037_v61  ;;  %v970_v8 = vrot.slane %v4192_v21, 3  ;;  %v3045_v9 = vld [vmem:[%s5333_s29 + $0x100] sm:$0xff]  ;;  %v972_v14 = vrot.slane %v4195_v22, 3 }
  0x2b   : > { %3496 = vmatprep.subr.bf16.mxu0 %v3495_v28  ;;  %733 = vmatprep.mubr.f32.mxu1 %v3981_v7  ;;  %v3515_v4 = vpack.c.bf16 %v3048_v0, %v3046_v63  ;;  %v853_v5 = vsel %vm846_vm2, %v850_v58, %v852_v2  ;;  %v3047_v10 = vld [vmem:[%s5333_s29 + $0x110] sm:$0xff]  ;;  %v3050_v11 = vld [vmem:[%s5333_s29 + $0x128] sm:$0xff]  ;;  %v3052_v12 = vld [vmem:[%s5333_s29 + $0x138] sm:$0xff]  ;;  %v974_v23 = vrot.slane %v4223_v38, 3  ;;  %v1091_v26 = vrot.slane %v4189_v20, 4 }
  0x2c   : > { %v971_v13 = vsel %vm968_vm3, %v969_v6, %v970_v8  ;;  %v3517_v15 = vpack.c.bf16 %v3047_v10, %v3045_v9  ;;  %v3519_v16 = vpack.c.bf16 %v3052_v12, %v3050_v11  ;;  %v3049_v17 = vld [vmem:[%s5333_s29 + $0x120] sm:$0xff]  ;;  %v3051_v18 = vld [vmem:[%s5333_s29 + $0x130] sm:$0xff]  ;;  %v973_v19 = vsel %vm968_vm3, %v970_v8, %v972_v14 }
  0x2d   : > { %3014 = vmatmul.mubr.msk.f32.gmra.mrb[2].mxu0 %vm642_vm1, %v639_v33  ;;  %3016 = vmatmul.mubr.msk.f32.gmra.mrb[2].mxu1 %vm642_vm1, %v640_v41  ;;  %v3521_v24 = vpack.c.bf16 %v3051_v18, %v3049_v17  ;;  %v975_v25 = vsel %vm968_vm3, %v972_v14, %v974_v23  ;;  %v1092_v27 = vrot.slane %v4192_v21, 4  ;;  %v1094_v29 = vrot.slane %v4195_v22, 4  ;;  %v1203_v37 = vld [vmem:[%s5335_s19] sm:$0x3] }
  0x2e   : > { %3498 = vmatpush1.bf16.msra.mxu0 %v3497_v34  ;;  %812 = vmatprep.mubr.f32.mxu0 %v3981_v7  ;;  %v1096_v31 = vrot.slane %v4223_v38, 4  ;;  %v1205_v34 = vlaneseq  ;;  %v1223_v39 = vld [vmem:[%s5336_s20] sm:$0x3]  ;;  %s594_s20 = sand.u32 1, %s3971_s30  }
  0x2f   : > { %3500 = vmatprep.subr.bf16.mxu0 %v3499_v35  ;;  %1346 = vmatprep.mubr.f32.mxu1 %v3981_v7  ;;  %v1093_v28 = vsel %vm1090_vm4, %v1091_v26, %v1092_v27  ;;  %v1095_v30 = vsel %vm1090_vm4, %v1092_v27, %v1094_v29  ;;  %s595_s2 = scalar_lea.vmem [#allocation2], %s594_s20  ;;  %s2907_s22 = scalar_lea.sflag [#allocation3], %s594_s20 }
  0x30   : > { %v1206_v35 = vshrl.u32 %v1205_v34, 7  ;;  %s2922_s23 = sshll.u32 %s595_s2, 4  ;;  %s2923_s23 = int_to_ptr.vmem [resolvable:$true] %s2922_s23 }
  0x31   : > { %3017 = vmatmul.mubr.msk.f32.vlgmr.msra.gmra.mrb[0].mxu0 %vm642_vm1, %v4189_v20  ;;  %v1097_v20 = vsel %vm1090_vm4, %v1094_v29, %v1096_v31  ;;  %s3917_s19 = scalar_lea.vmem %s2923_s23, 16  ;;  %p3924_p0 = scmp.lt.s32.totalorder %s2923_s23, %s3922_s28 }
  0x32   : > { %818 = vmatprep.mubr.f32.mxu0 %v3981_v7  ;;  %3502 = vmatpush1.bf16.msra.mxu0 %v3501_v42  ;;  %v4351_v36 = vsub.s32 0, %v1206_v35  ;;  %p3918_p11 = scmp.ne.s32.totalorder %s2923_s23, %s3917_s19 }
  0x33   : > { %3504 = vmatprep.subr.bf16.mxu0 %v3503_v43 }
  0x34   : > { %v1208_v40 = vrot.slane %v1203_v37, %v4351_v36  ;;  %v1228_v42 = vrot.slane %v1223_v39, %v4351_v36  ;;  %p3919_p12 = pnand %p3918_p11, %p4124_p5 }
  0x35   : > { %3018 = vmatmul.mubr.msk.f32.gmra.mrb[2].mxu0 %vm642_vm1, %v4192_v21 }
  0x36   : > { %824 = vmatprep.mubr.f32.mxu0 %v3981_v7  ;;  %3506 = vmatpush1.bf16.msra.mxu0 %v3505_v49  ;;  %p3920_p13 = pneg %p3919_p12 }
  0x37   : > { %3508 = vmatprep.subr.bf16.mxu0 %v3507_v50 }
  0x39   : > { %3019 = vmatmul.mubr.msk.f32.gmra.mrb[4].mxu0 %vm642_vm1, %v4195_v22 }
  0x3a   : > { %830 = vmatprep.mubr.f32.mxu0 %v3981_v7 }
  0x3d   : > { %3020 = vmatmul.mubr.msk.f32.gmra.mrb[6].mxu0 %vm642_vm1, %v4223_v38  ;;  %v4356_v38 = vsub.s32 1, %v1206_v35  ;;  %v1361_v35 = vld [vmem:[%s5297_s5 + $0x10] sm:$0xff] }
  0x3e   : > { %926 = vmatprep.mubr.f32.mxu0 %v3981_v7 }
  0x3f   : > { %v1212_v41 = vrot.slane %v1203_v37, %v4356_v38  ;;  %v1232_v44 = vrot.slane %v1223_v39, %v4356_v38  ;;  %v1362_v37 = vld [vmem:[%s5297_s5 + $0x18] sm:$0xff]  ;;  %v1268_v39 = vld [vmem:[%s5337_s4 + $0x8] sm:$0x3f] }
  0x41   : > { %3029 = vmatmul.mubr.msk.f32.vlgmr.msra.gmra.mrb[0].mxu0 %vm642_vm1, %v849_v57 }
  0x42   : > { %932 = vmatprep.mubr.f32.mxu0 %v3981_v7  ;;  %3510 = vmatpush1.bf16.msra.mxu0 %v3509_v59 }
  0x43   : > { %3512 = vmatprep.subr.bf16.mxu0 %v3511_v60 }
  0x45   : > { %3030 = vmatmul.mubr.msk.f32.gmra.mrb[2].mxu0 %vm642_vm1, %v851_v1 }
  0x46   : > { %938 = vmatprep.mubr.f32.mxu0 %v3981_v7  ;;  %3514 = vmatpush1.bf16.msra.mxu0 %v3513_v3 }
  0x47   : > { %3516 = vmatprep.subr.bf16.mxu0 %v3515_v4 }
  0x49   : > { %3031 = vmatmul.mubr.msk.f32.gmra.mrb[4].mxu0 %vm642_vm1, %v853_v5 }
  0x4a   : > { %944 = vmatprep.mubr.f32.mxu0 %v3981_v7 }
  0x4d   : > { %3032 = vmatmul.mubr.msk.f32.gmra.mrb[6].mxu0 %vm642_vm1, %v852_v2 }
  0x4e   : > { %1048 = vmatprep.mubr.f32.mxu0 %v3981_v7 }
  0x51   : > { %3041 = vmatmul.mubr.msk.f32.vlgmr.msra.gmra.mrb[0].mxu0 %vm642_vm1, %v971_v13 }
  0x52   : > { %1054 = vmatprep.mubr.f32.mxu0 %v3981_v7  ;;  %3518 = vmatpush1.bf16.msra.mxu0 %v3517_v15 }
  0x53   : > { %3520 = vmatprep.subr.bf16.mxu0 %v3519_v16 }
  0x55   : > { %3042 = vmatmul.mubr.msk.f32.gmra.mrb[2].mxu0 %vm642_vm1, %v973_v19 }
  0x56   : > { %1060 = vmatprep.mubr.f32.mxu0 %v3981_v7  ;;  %3522 = vmatpush1.bf16.msra.mxu0 %v3521_v24 }
  0x59   : > { %3043 = vmatmul.mubr.msk.f32.gmra.mrb[4].mxu0 %vm642_vm1, %v975_v25 }
  0x5a   : > { %1066 = vmatprep.mubr.f32.mxu0 %v3981_v7 }
  0x5d   : > { %3044 = vmatmul.mubr.msk.f32.gmra.mrb[6].mxu0 %vm642_vm1, %v974_v23 }
  0x5e   : > { %1170 = vmatprep.mubr.f32.mxu0 %v3981_v7 }
  0x61   : > { %3053 = vmatmul.mubr.msk.f32.vlgmr.msra.gmra.mrb[0].mxu0 %vm642_vm1, %v1093_v28 }
  0x62   : > { %1176 = vmatprep.mubr.f32.mxu0 %v3981_v7 }
  0x65   : > { %3054 = vmatmul.mubr.msk.f32.gmra.mrb[2].mxu0 %vm642_vm1, %v1095_v30 }
  0x66   : > { %1182 = vmatprep.mubr.f32.mxu0 %v3981_v7 }
  0x69   : > { %3055 = vmatmul.mubr.msk.f32.gmra.mrb[4].mxu0 %vm642_vm1, %v1097_v20  ;;  %v1359_v20 = vld [vmem:[%s5297_s5] sm:$0xff] }
  0x6a   : > { %1188 = vmatprep.mubr.f32.mxu0 %v3981_v7 }
  0x6d   : > { %3056 = vmatmul.mubr.msk.f32.gmra.mrb[6].mxu0 %vm642_vm1, %v1096_v31 }
  0x6e   : > { %2158 = vmatprep.mubr.f32.mxu0 %v3981_v7 }
  0xfc   : > { %v729_v21 = vpop.f32.mrb[0].mxu1 }
  0xfd   : > { %v731_v22 = vpop.f32.mrb[1].mxu1 }
 0x100   : > { %v735_v32 = vpop.f32.mrb[2].mxu1 }
 0x101   : > { %v737_v33 = vpop.f32.mrb[3].mxu1 }
 0x134   : > { %v1172_v43 = vpop.f32.mrb[0].mxu0 }
 0x135   : > { %v1215_v45 = vmul.f32 %v1208_v40, %v1172_v43  ;;  %v1174_v46 = vpop.f32.mrb[1].mxu0 }
 0x136   : > { %v1216_v47 = vmul.f32 %v1212_v41, %v1174_v46 }
 0x137   : > { %v1235_v48 = vadd.f32 %v1228_v42, %v1215_v45  ;;  %v1366_v45 = vld [vmem:[%s5297_s5 + $0x38] sm:$0xff] }
 0x138   : > { %v1236_v49 = vadd.f32 %v1232_v44, %v1216_v47  ;;  %v1178_v50 = vpop.f32.mrb[2].mxu0  ;;  %v1367_v47 = vld [vmem:[%s5297_s5 + $0x40] sm:$0xff] }
 0x139   : > { %v1217_v51 = vmul.f32 %v1208_v40, %v1178_v50  ;;  %v1180_v52 = vpop.f32.mrb[3].mxu0  ;;  %v1251_v54 = vmul.f32 0.1, %v1235_v48  ;;  %vm1243_vm5 = vcmp.gt.f32.partialorder %v1235_v48, 0.0  ;;  %v1369_v50 = vld [vmem:[%s5297_s5 + $0x50] sm:$0xff] }
 0x13a   : > { %v1218_v53 = vmul.f32 %v1212_v41, %v1180_v52  ;;  %v1252_v56 = vmul.f32 0.1, %v1236_v49  ;;  %vm1244_vm6 = vcmp.gt.f32.partialorder %v1236_v49, 0.0 }
 0x13b   : > { %v1237_v55 = vadd.f32 %v1228_v42, %v1217_v51  ;;  %v1259_v0 = vsel %vm1243_vm5, %v1235_v48, %v1251_v54  ;;  %v1368_v48 = vld [vmem:[%s5297_s5 + $0x48] sm:$0xff]  ;;  %v1370_v51 = vld [vmem:[%s5297_s5 + $0x58] sm:$0xff]  ;;  %vm1380_vm5 = vcmask 326656  }
 0x13c   : > { %v1238_v57 = vadd.f32 %v1232_v44, %v1218_v53  ;;  %v1184_v58 = vpop.f32.mrb[4].mxu0  ;;  %v1260_v5 = vsel %vm1244_vm6, %v1236_v49, %v1252_v56  ;;  %v3546_v49 = vpack.c.bf16 %v1368_v48, %v1367_v47  ;;  %v3549_v52 = vpack.c.bf16 %v1370_v51, %v1369_v50  ;;  %v1371_v53 = vld [vmem:[%s5297_s5 + $0x60] sm:$0xff]  ;;  %v1372_v54 = vld [vmem:[%s5297_s5 + $0x68] sm:$0xff]  ;;  %v1373_v56 = vld [vmem:[%s5297_s5 + $0x70] sm:$0xff] }
 0x13d   : > { %vm1245_vm7 = vcmp.gt.f32.partialorder %v1237_v55, 0.0  ;;  %v1253_v59 = vmul.f32 0.1, %v1237_v55  ;;  %v3814_v60 = vadd.f32 %v1184_v58, %v729_v21  ;;  %v1186_v61 = vpop.f32.mrb[5].mxu0  ;;  %v1360_v21 = vld [vmem:[%s5297_s5 + $0x8] sm:$0xff]  ;;  %v1462_v47 = vld [vmem:[%s5298_s6] sm:$0xff] }
 0x13e   : > { %vm1246_vm8 = vcmp.gt.f32.partialorder %v1238_v57, 0.0  ;;  %v1254_v62 = vmul.f32 0.1, %v1238_v57  ;;  %v3815_v63 = vadd.f32 %v1186_v61, %v731_v22  ;;  %v1267_v22 = vld [vmem:[%s5337_s4] sm:$0xff]  ;;  %v1464_v48 = vld [vmem:[%s5298_s6 + $0x10] sm:$0xff]  ;;  %vm1512_vm6 = vcmask 687104  }
 0x13f   : > { %v1261_v1 = vsel %vm1245_vm7, %v1237_v55, %v1253_v59  ;;  %v1219_v2 = vmul.f32 %v3814_v60, %v1208_v40  ;;  %v3552_v55 = vpack.c.bf16 %v1372_v54, %v1371_v53  ;;  %v1375_v59 = vld [vmem:[%s5297_s5 + $0x80] sm:$0xff]  ;;  %v1376_v60 = vld [vmem:[%s5297_s5 + $0x88] sm:$0xff]  ;;  %v3585_v50 = vpack.c.bf16 %v1464_v48, %v1462_v47  ;;  %s3923_s4 = scalar_lea.vmem %s3922_s28, 32 }
 0x140   : > { %v1220_v3 = vmul.f32 %v3815_v63, %v1212_v41  ;;  %v1190_v4 = vpop.f32.mrb[6].mxu0  ;;  %v1262_v6 = vsel %vm1246_vm8, %v1238_v57, %v1254_v62  ;;  %v3525_v8 = vpack.c.bf16 %v1261_v1, %v1259_v0  ;;  %v1374_v57 = vld [vmem:[%s5297_s5 + $0x78] sm:$0xff]  ;;  %v3558_v61 = vpack.c.bf16 %v1376_v60, %v1375_v59  ;;  %v1377_v62 = vld [vmem:[%s5297_s5 + $0x90] sm:$0xff]  ;;  %v1379_v1 = vld [vmem:[%s5297_s5 + $0xa0] sm:$0xff]  ;;  %p3925_p1 = scmp.lt.s32.totalorder %s3923_s4, %s3917_s19 }
 0x141   : > { %v1239_v9 = vadd.f32 %v1228_v42, %v1219_v2  ;;  %v3816_v10 = vadd.f32 %v1190_v4, %v735_v32  ;;  %v1192_v11 = vpop.f32.mrb[7].mxu0  ;;  %v3523_v12 = vpack.c.bf16 %v1262_v6, %v1260_v5  ;;  %v3534_v32 = vpack.c.bf16 %v1360_v21, %v1359_v20  ;;  %v1378_v63 = vld [vmem:[%s5297_s5 + $0x98] sm:$0xff]  ;;  %v3063_v5 = vld [vmem:[%s5298_s6 + $0xb0] sm:$0xff]  ;;  %v3065_v6 = vld [vmem:[%s5298_s6 + $0xc0] sm:$0xff] }
 0x142   : > { %v1240_v13 = vadd.f32 %v1232_v44, %v1220_v3  ;;  %v3817_v14 = vadd.f32 %v1192_v11, %v737_v33  ;;  %v3983_v33 = vmov 0.0|0.0   ;;  %v3555_v58 = vpack.c.bf16 %v1374_v57, %v1373_v56  ;;  %v3064_v2 = vld [vmem:[%s5298_s6 + $0xb8] sm:$0xff]  ;;  %v3066_v3 = vld [vmem:[%s5298_s6 + $0xc8] sm:$0xff]  ;;  %v3077_v20 = vld [vmem:[%s5298_s6 + $0x120] sm:$0xff]  ;;  %p3926_p2 = por %p3925_p1, %p3924_p0 }
 0x143   : > { %v1221_v15 = vmul.f32 %v3816_v10, %v1208_v40  ;;  %3524 = vmatprep.subr.bf16.mxu1 %v3523_v12  ;;  %v1255_v17 = vmul.f32 0.1, %v1239_v9  ;;  %vm1247_vm9 = vcmp.gt.f32.partialorder %v1239_v9, 0.0  ;;  %v3537_v40 = vpack.c.bf16 %v1362_v37, %v1361_v35  ;;  %v3079_v37 = vld [vmem:[%s5298_s6 + $0x130] sm:$0xff]  ;;  %v1467_v51 = vld [vmem:[%s5298_s6 + $0x28] sm:$0xff]  ;;  %v3101_v48 = vld [vmem:[%s5298_s6 + $0x1a0] sm:$0xff] }
 0x144   : > { %v1222_v16 = vmul.f32 %v3817_v14, %v1212_v41  ;;  %3526 = vmatpush1.bf16.msra.mxu1 %v3525_v8  ;;  %v1256_v19 = vmul.f32 0.1, %v1240_v13  ;;  %vm1248_vm10 = vcmp.gt.f32.partialorder %v1240_v13, 0.0  ;;  %v1363_v41 = vld [vmem:[%s5297_s5 + $0x20] sm:$0xff]  ;;  %v3561_v0 = vpack.c.bf16 %v1378_v63, %v1377_v62  ;;  %v3068_v8 = vld [vmem:[%s5298_s6 + $0xd8] sm:$0xff]  ;;  %v3067_v14 = vld [vmem:[%s5298_s6 + $0xd0] sm:$0xff]  ;;  %p3927_p3 = pnand %p3926_p2, %p3920_p13 }
 0x145   : > { %v1241_v18 = vadd.f32 %v1228_v42, %v1221_v15  ;;  %v1263_v26 = vsel %vm1247_vm9, %v1239_v9, %v1255_v17  ;;  %v1364_v42 = vld [vmem:[%s5297_s5 + $0x28] sm:$0xff]  ;;  %v3563_v4 = vpack.c.bf16 %v3066_v3, %v3064_v2  ;;  %v3565_v11 = vpack.c.bf16 %v3065_v6, %v3063_v5  ;;  %v3069_v15 = vld [vmem:[%s5298_s6 + $0xe0] sm:$0xff] }
 0x146   : > { %v1242_v23 = vadd.f32 %v1232_v44, %v1222_v16  ;;  %v1264_v29 = vsel %vm1248_vm10, %v1240_v13, %v1256_v19  ;;  %v3540_v43 = vpack.c.bf16 %v1364_v42, %v1363_v41  ;;  %v1365_v44 = vld [vmem:[%s5297_s5 + $0x30] sm:$0xff]  ;;  %v3070_v9 = vld [vmem:[%s5298_s6 + $0xe8] sm:$0xff]  ;;  %v3072_v16 = vld [vmem:[%s5298_s6 + $0xf8] sm:$0xff]  ;;  %v3569_v19 = vpack.c.bf16 %v3069_v15, %v3067_v14 }
 0x147   : > { %vm1249_vm11 = vcmp.gt.f32.partialorder %v1241_v18, 0.0  ;;  %v1257_v24 = vmul.f32 0.1, %v1241_v18  ;;  %v3543_v46 = vpack.c.bf16 %v1366_v45, %v1365_v44  ;;  %v3567_v13 = vpack.c.bf16 %v3070_v9, %v3068_v8  ;;  %v3074_v17 = vld [vmem:[%s5298_s6 + $0x108] sm:$0xff]  ;;  %v3084_v41 = vld [vmem:[%s5298_s6 + $0x158] sm:$0xf] }
 0x148   : > { %vm1250_vm12 = vcmp.gt.f32.partialorder %v1242_v23, 0.0  ;;  %v1258_v25 = vmul.f32 0.1, %v1242_v23  ;;  %v1463_v42 = vld [vmem:[%s5298_s6 + $0x8] sm:$0xff]  ;;  %v3083_v44 = vld [vmem:[%s5298_s6 + $0x150] sm:$0xf] }
 0x149   : > { %v1265_v27 = vsel %vm1249_vm11, %v1241_v18, %v1257_v24  ;;  %v3571_v24 = vpack.c.bf16 %v3074_v17, %v3072_v16  ;;  %v1471_v3 = vld [vmem:[%s5298_s6 + $0x48] sm:$0xff]  ;;  %v1477_v14 = vld [vmem:[%s5298_s6 + $0x78] sm:$0xff]  ;;  %v1474_v17 = vld [vmem:[%s5298_s6 + $0x60] sm:$0xff]  ;;  %vm2087_vm7 = vcmask 1041408   ;;  %vm2083_vm10 = vcmask 80896  }
 0x14a   : > { %v3530_v28 = vpack.c.bf16 %v1265_v27, %v1263_v26  ;;  %v1266_v30 = vsel %vm1250_vm12, %v1242_v23, %v1258_v25  ;;  %v3071_v25 = vld [vmem:[%s5298_s6 + $0xf0] sm:$0xff]  ;;  %v3073_v26 = vld [vmem:[%s5298_s6 + $0x100] sm:$0xff]  ;;  %v3076_v27 = vld [vmem:[%s5298_s6 + $0x118] sm:$0xff]  ;;  %vm2281_vm11 = vcmask 654336  }
 0x14b   : > { %v3527_v31 = vpack.c.bf16 %v1266_v30, %v1264_v29  ;;  %v3573_v29 = vpack.c.bf16 %v3073_v26, %v3071_v25  ;;  %v1478_v26 = vld [vmem:[%s5298_s6 + $0x80] sm:$0xff]  ;;  %vm3664_vm9 = vmpackc.low %vm2087_vm7, %vm3982_vm13  ;;  %vm2704_vm13 = vcmask 982016  }
 0x14d   : > { %3529 = vmatprep.subr.msk.bf16.mxu1 %vm3528_vm14, %v3527_v31  ;;  %v3075_v31 = vld [vmem:[%s5298_s6 + $0x110] sm:$0xff] }
 0x14e   : > { %3532 = vmatpush1.bf16.msk.msra.mxu1 %vm3528_vm14, %v3530_v28  ;;  %v3078_v28 = vld [vmem:[%s5298_s6 + $0x128] sm:$0xff]  ;;  %v3577_v21 = vpack.c.bf16 %v3077_v20, %v3075_v31  ;;  %v3096_v31 = vld [vmem:[%s5298_s6 + $0x178] sm:$0xff]  ;;  %v3093_v20 = vld [vmem:[%s5298_s6 + $0x160] sm:$0xff] }
 0x14f   : > { %3533 = vmatprep.subr.bf16.mxu1 %v3983_v33  ;;  %v3575_v30 = vpack.c.bf16 %v3078_v28, %v3076_v27  ;;  %v1480_v27 = vld [vmem:[%s5298_s6 + $0x90] sm:$0xff] }
 0x150   : > { %v3601_v28 = vpack.c.bf16 %v1480_v27, %v1478_v26  ;;  %v3127_v26 = vld [vmem:[%s5298_s6 + $0x250] sm:$0xff]  ;;  %v3129_v27 = vld [vmem:[%s5298_s6 + $0x260] sm:$0xff] }
 0x151   : > { %3059 = vmatmul.mubr.msk.f32.vlgmr.msra.gmra.mrb[4].mxu1 %vm1269_vm15, %v1267_v22  ;;  %v3080_v22 = vld [vmem:[%s5298_s6 + $0x138] sm:$0xff] }
 0x152   : > { %1352 = vmatprep.mubr.f32.mxu1 %v3981_v7  ;;  %3535 = vmatpush1.bf16.msra.mxu1 %v3534_v32  ;;  %v3082_v32 = vld [vmem:[%s5298_s6 + $0x148] sm:$0xff] }
 0x153   : > { %3536 = vmatprep.subr.bf16.mxu1 %v3983_v33  ;;  %v3579_v35 = vpack.c.bf16 %v3082_v32, %v3080_v22  ;;  %v3098_v22 = vld [vmem:[%s5298_s6 + $0x188] sm:$0xff]  ;;  %v3100_v32 = vld [vmem:[%s5298_s6 + $0x198] sm:$0xff] }
 0x155   : > { %3060 = vmatmul.mubr.msk.f32.gmra.mrb[6].mxu1 %vm1269_vm15, %v1268_v39  ;;  %v3081_v39 = vld [vmem:[%s5298_s6 + $0x140] sm:$0xff]  ;;  %vm2869_vm15 = vcmask 73728  }
 0x156   : > { %3538 = vmatpush1.bf16.msra.mxu1 %v3537_v40  ;;  %v3581_v40 = vpack.c.bf16 %v3081_v39, %v3079_v37 }
 0x157   : > { %3539 = vmatprep.subr.bf16.mxu1 %v3983_v33 }
 0x15a   : > { %3541 = vmatpush1.bf16.msra.mxu1 %v3540_v43  ;;  %v1465_v43 = vld [vmem:[%s5298_s6 + $0x18] sm:$0xff] }
 0x15b   : > { %3542 = vmatprep.subr.bf16.mxu1 %v3983_v33  ;;  %v3583_v45 = vpack.c.bf16 %v1465_v43, %v1463_v42  ;;  %v3099_v42 = vld [vmem:[%s5298_s6 + $0x190] sm:$0xff]  ;;  %v3102_v43 = vld [vmem:[%s5298_s6 + $0x1a8] sm:$0xff] }
 0x15e   : > { %3544 = vmatpush1.bf16.msra.mxu1 %v3543_v46 }
 0x15f   : > { %3545 = vmatprep.subr.bf16.mxu1 %v3983_v33 }
 0x162   : > { %3547 = vmatpush1.bf16.msra.mxu1 %v3546_v49 }
 0x163   : > { %3548 = vmatprep.subr.bf16.mxu1 %v3983_v33 }
 0x166   : > { %3550 = vmatpush1.bf16.msra.mxu1 %v3549_v52  ;;  %v1469_v52 = vld [vmem:[%s5298_s6 + $0x38] sm:$0xff] }
 0x167   : > { %3551 = vmatprep.subr.bf16.mxu1 %v3983_v33  ;;  %v3587_v63 = vpack.c.bf16 %v1469_v52, %v1467_v51 }
 0x16a   : > { %3553 = vmatpush1.bf16.msra.mxu1 %v3552_v55 }
 0x16b   : > { %3554 = vmatprep.subr.bf16.mxu1 %v3983_v33 }
 0x16e   : > { %3556 = vmatpush1.bf16.msra.mxu1 %v3555_v58 }
 0x16f   : > { %3557 = vmatprep.subr.bf16.mxu1 %v3983_v33 }
 0x172   : > { %3559 = vmatpush1.bf16.msra.mxu1 %v3558_v61 }
 0x173   : > { %3560 = vmatprep.subr.bf16.mxu1 %v3983_v33 }
 0x176   : > { %3562 = vmatpush1.bf16.msra.mxu1 %v3561_v0  ;;  %v1466_v0 = vld [vmem:[%s5298_s6 + $0x20] sm:$0xff] }
 0x177   : > { %1427 = vmatprep.subr.mxu1 %v3981_v7 }
 0x17a   : > { %1428 = vmatpush1.msra.mxu1 %v1379_v1  ;;  %v1468_v1 = vld [vmem:[%s5298_s6 + $0x30] sm:$0xff] }
 0x17b   : > { %3564 = vmatprep.subr.bf16.mxu1 %v3563_v4  ;;  %v1473_v4 = vld [vmem:[%s5298_s6 + $0x58] sm:$0xff]  ;;  %v3589_v9 = vpack.c.bf16 %v1468_v1, %v1466_v0  ;;  %v3111_v0 = vld [vmem:[%s5298_s6 + $0x1f0] sm:$0xff] }
 0x224   : > { %v1348_v10 = vpop.f32.mrb[4].mxu1 }
 0x225   : > { %v1350_v12 = vpop.f32.mrb[5].mxu1 }
 0x226   : > { %3061 = vmatprep.mubr.msk.f32.mxu1 %vm1380_vm5, %v1350_v12  ;;  %v1472_v12 = vld [vmem:[%s5298_s6 + $0x50] sm:$0xff] }
 0x227   : > { %1452 = vmatmul.mubr.f32.vlgmr.msra.gmra.mrb[8].mxu1 %v1348_v10  ;;  %v3591_v10 = vpack.c.bf16 %v1473_v4, %v1471_v3  ;;  %v3120_v3 = vld [vmem:[%s5298_s6 + $0x218] sm:$0xff]  ;;  %v3122_v4 = vld [vmem:[%s5298_s6 + $0x228] sm:$0xff] }
 0x228   : > { %v1354_v18 = vpop.f32.mrb[6].mxu1  ;;  %3566 = vmatpush1.bf16.msra.mxu1 %v3565_v11  ;;  %v1470_v11 = vld [vmem:[%s5298_s6 + $0x40] sm:$0xff] }
 0x229   : > { %v1356_v23 = vpop.f32.mrb[7].mxu1  ;;  %3568 = vmatprep.subr.bf16.mxu1 %v3567_v13  ;;  %v1475_v13 = vld [vmem:[%s5298_s6 + $0x68] sm:$0xff]  ;;  %v3593_v15 = vpack.c.bf16 %v1472_v12, %v1470_v11  ;;  %v3124_v11 = vld [vmem:[%s5298_s6 + $0x238] sm:$0xff] }
 0x22a   : > { %3062 = vmatprep.mubr.msk.f32.mxu1 %vm1380_vm5, %v1356_v23  ;;  %v3595_v16 = vpack.c.bf16 %v1477_v14, %v1475_v13  ;;  %v1481_v23 = vld [vmem:[%s5298_s6 + $0x98] sm:$0xff]  ;;  %v3126_v12 = vld [vmem:[%s5298_s6 + $0x248] sm:$0xff]  ;;  %v3113_v13 = vld [vmem:[%s5298_s6 + $0x200] sm:$0xf]  ;;  %v3623_v14 = vpack.c.bf16 %v3122_v4, %v3120_v3 }
 0x22b   : > { %1457 = vmatmul.mubr.f32.gmra.mrb[10].mxu1 %v1354_v18  ;;  %v1476_v18 = vld [vmem:[%s5298_s6 + $0x70] sm:$0xff]  ;;  %v3162_v4 = vld [vmem:[%s5298_s6 + $0x348] sm:$0xff] }
 0x22c   : > { %3570 = vmatpush1.bf16.msra.mxu1 %v3569_v19  ;;  %1587 = vmatprep.mubr.f32.mxu1 %v3981_v7  ;;  %v1479_v19 = vld [vmem:[%s5298_s6 + $0x88] sm:$0xff]  ;;  %v3159_v3 = vld [vmem:[%s5298_s6 + $0x330] sm:$0xff] }
 0x22d   : > { %3572 = vmatprep.subr.bf16.mxu1 %v3571_v24  ;;  %v3597_v24 = vpack.c.bf16 %v1476_v18, %v1474_v17  ;;  %v3599_v25 = vpack.c.bf16 %v1481_v23, %v1479_v19  ;;  %v3123_v17 = vld [vmem:[%s5298_s6 + $0x230] sm:$0xff]  ;;  %v3125_v18 = vld [vmem:[%s5298_s6 + $0x240] sm:$0xff]  ;;  %v3128_v19 = vld [vmem:[%s5298_s6 + $0x258] sm:$0xff] }
 0x22e   : > { %v3130_v23 = vld [vmem:[%s5298_s6 + $0x268] sm:$0xff] }
 0x230   : > { %3574 = vmatpush1.bf16.msra.mxu1 %v3573_v29  ;;  %v1483_v29 = vld [vmem:[%s5298_s6 + $0xa8] sm:$0xf] }
 0x231   : > { %3576 = vmatprep.subr.bf16.mxu1 %v3575_v30  ;;  %v3094_v30 = vld [vmem:[%s5298_s6 + $0x168] sm:$0xff] }
 0x232   : > { %v3603_v37 = vpack.c.bf16 %v3096_v31, %v3094_v30  ;;  %v3131_v31 = vld [vmem:[%s5298_s6 + $0x270] sm:$0xff] }
 0x234   : > { %3578 = vmatpush1.bf16.msra.mxu1 %v3577_v21  ;;  %v3095_v21 = vld [vmem:[%s5298_s6 + $0x170] sm:$0xff] }
 0x235   : > { %3580 = vmatprep.subr.bf16.mxu1 %v3579_v35  ;;  %v1482_v35 = vld [vmem:[%s5298_s6 + $0xa0] sm:$0xf]  ;;  %v3605_v39 = vpack.c.bf16 %v3095_v21, %v3093_v20  ;;  %v3136_v21 = vld [vmem:[%s5298_s6 + $0x298] sm:$0xff] }
 0x236   : > { %v3133_v20 = vld [vmem:[%s5298_s6 + $0x280] sm:$0xff] }
 0x238   : > { %3582 = vmatpush1.bf16.msra.mxu1 %v3581_v40  ;;  %v3607_v40 = vpack.c.bf16 %v3100_v32, %v3098_v22  ;;  %v3637_v22 = vpack.c.bf16 %v3133_v20, %v3131_v31 }
 0x239   : > { %3085 = vmatprep.subr.msk.mxu1 %vm1090_vm4, %v3084_v41  ;;  %v3097_v41 = vld [vmem:[%s5298_s6 + $0x180] sm:$0xff] }
 0x23c   : > { %3086 = vmatpush1.msk.msra.mxu1 %vm1090_vm4, %v3083_v44  ;;  %v3104_v44 = vld [vmem:[%s5298_s6 + $0x1b8] sm:$0xff] }
 0x23d   : > { %3584 = vmatprep.subr.bf16.mxu1 %v3583_v45  ;;  %v3609_v45 = vpack.c.bf16 %v3099_v42, %v3097_v41  ;;  %v3611_v47 = vpack.c.bf16 %v3104_v44, %v3102_v43  ;;  %v3146_v41 = vld [vmem:[%s5298_s6 + $0x2c8] sm:$0xff]  ;;  %v3148_v42 = vld [vmem:[%s5298_s6 + $0x2d8] sm:$0xff]  ;;  %v3145_v43 = vld [vmem:[%s5298_s6 + $0x2c0] sm:$0xff] }
 0x23e   : > { %v3147_v44 = vld [vmem:[%s5298_s6 + $0x2d0] sm:$0xff] }
 0x2fa   : > { %v4525_v46 = vpop.f32.mrb[8].mxu1 }
 0x2fb   : > { %v1455_v49 = vpop.f32.mrb[9].mxu1  ;;  %v1509_v53 = vrot.slane %v4525_v46, 1  ;;  %v1710_v54 = vrot.slane %v4525_v46, 2  ;;  %v1827_v55 = vrot.slane %v4525_v46, 3  ;;  %v1944_v56 = vrot.slane %v4525_v46, 4 }
 0x2fc   : > { %v3103_v49 = vld [vmem:[%s5298_s6 + $0x1b0] sm:$0xff] }
 0x2fd   : > { %v3613_v51 = vpack.c.bf16 %v3103_v49, %v3101_v48  ;;  %v3139_v48 = vld [vmem:[%s5298_s6 + $0x2b0] sm:$0xf]  ;;  %v3643_v49 = vpack.c.bf16 %v3148_v42, %v3146_v41  ;;  %v2165_v41 = vld [vmem:[%s5302_s10] sm:$0xff]  ;;  %v2166_v42 = vld [vmem:[%s5302_s10 + $0x8] sm:$0xff] }
 0x2fe   : > { %v4543_v57 = vpop.f32.mrb[10].mxu1 }
 0x2ff   : > { %v1510_v58 = vrot.slane %v4543_v57, 1  ;;  %v1711_v59 = vrot.slane %v4543_v57, 2  ;;  %v1828_v60 = vrot.slane %v4543_v57, 3  ;;  %v1945_v61 = vrot.slane %v4543_v57, 4  ;;  %v1460_v62 = vpop.f32.mrb[11].mxu1 }
 0x301   : > { %v1511_v2 = vsel %vm634_vm0, %v1509_v53, %v1510_v58  ;;  %v4565_v5 = vsel %vm846_vm2, %v1710_v54, %v1711_v59  ;;  %v4570_v6 = vsel %vm968_vm3, %v1827_v55, %v1828_v60  ;;  %v4575_v8 = vsel %vm1090_vm4, %v1944_v56, %v1945_v61  ;;  %v3105_v53 = vld [vmem:[%s5298_s6 + $0x1c0] sm:$0xff]  ;;  %v3107_v54 = vld [vmem:[%s5298_s6 + $0x1d0] sm:$0xff]  ;;  %v3110_v55 = vld [vmem:[%s5298_s6 + $0x1e8] sm:$0xff] }
 0x302   : > { %3087 = vmatmul.mubr.msk.f32.vlgmr.msra.gmra.mrb[12].mxu1 %vm1512_vm6, %v1511_v2  ;;  %v3112_v56 = vld [vmem:[%s5298_s6 + $0x1f8] sm:$0xff]  ;;  %v3114_v2 = vld [vmem:[%s5298_s6 + $0x208] sm:$0xf] }
 0x303   : > { %3586 = vmatpush1.bf16.msra.mxu1 %v3585_v50  ;;  %1593 = vmatprep.mubr.f32.mxu1 %v3981_v7  ;;  %v3106_v50 = vld [vmem:[%s5298_s6 + $0x1c8] sm:$0xff]  ;;  %v3619_v62 = vpack.c.bf16 %v3112_v56, %v3110_v55 }
 0x304   : > { %3588 = vmatprep.subr.bf16.mxu1 %v3587_v63  ;;  %v3109_v63 = vld [vmem:[%s5298_s6 + $0x1e0] sm:$0xff] }
 0x305   : > { %v3621_v1 = vpack.c.bf16 %v3111_v0, %v3109_v63  ;;  %v3158_v63 = vld [vmem:[%s5298_s6 + $0x328] sm:$0xff] }
 0x306   : > { %3088 = vmatmul.mubr.msk.f32.gmra.mrb[14].mxu1 %vm1512_vm6, %v1510_v58  ;;  %v3617_v58 = vpack.c.bf16 %v3107_v54, %v3105_v53  ;;  %v3154_v53 = vld [vmem:[%s5298_s6 + $0x308] sm:$0xff]  ;;  %v3156_v54 = vld [vmem:[%s5298_s6 + $0x318] sm:$0xff] }
 0x307   : > { %3590 = vmatpush1.bf16.msra.mxu1 %v3589_v9  ;;  %1674 = vmatprep.mubr.f32.mxu1 %v3981_v7  ;;  %v3119_v9 = vld [vmem:[%s5298_s6 + $0x210] sm:$0xff]  ;;  %v3651_v56 = vpack.c.bf16 %v3156_v54, %v3154_v53  ;;  %v2173_v54 = vld [vmem:[%s5302_s10 + $0x40] sm:$0xff] }
 0x308   : > { %3592 = vmatprep.subr.bf16.mxu1 %v3591_v10  ;;  %v3121_v10 = vld [vmem:[%s5298_s6 + $0x220] sm:$0xff] }
 0x30b   : > { %3594 = vmatpush1.bf16.msra.mxu1 %v3593_v15  ;;  %v3625_v15 = vpack.c.bf16 %v3121_v10, %v3119_v9 }
 0x30c   : > { %3596 = vmatprep.subr.bf16.mxu1 %v3595_v16  ;;  %v3627_v16 = vpack.c.bf16 %v3126_v12, %v3124_v11  ;;  %v3161_v11 = vld [vmem:[%s5298_s6 + $0x340] sm:$0xff]  ;;  %v3163_v12 = vld [vmem:[%s5298_s6 + $0x350] sm:$0xff] }
 0x30f   : > { %3598 = vmatpush1.bf16.msra.mxu1 %v3597_v24  ;;  %v3629_v24 = vpack.c.bf16 %v3125_v18, %v3123_v17  ;;  %v2054_v17 = vld [vmem:[%s5300_s8] sm:$0x3] }
 0x310   : > { %3600 = vmatprep.subr.bf16.mxu1 %v3599_v25  ;;  %v3631_v25 = vpack.c.bf16 %v3130_v23, %v3128_v19  ;;  %v2059_v19 = vrot.slane %v2054_v17, %v4351_v36 }
 0x313   : > { %3602 = vmatpush1.bf16.msra.mxu1 %v3601_v28  ;;  %v3132_v28 = vld [vmem:[%s5298_s6 + $0x278] sm:$0xff] }
 0x314   : > { %3089 = vmatprep.subr.msk.mxu1 %vm1090_vm4, %v1483_v29  ;;  %v3633_v29 = vpack.c.bf16 %v3129_v27, %v3127_v26 }
 0x317   : > { %3090 = vmatpush1.msk.msra.mxu1 %vm1090_vm4, %v1482_v35  ;;  %v3135_v35 = vld [vmem:[%s5298_s6 + $0x290] sm:$0xff] }
 0x318   : > { %3091 = vmatmul.mubr.msk.f32.vlgmr.msra.gmra.mrb[12].mxu1 %vm1512_vm6, %v4525_v46  ;;  %3604 = vmatprep.subr.bf16.mxu1 %v3603_v37  ;;  %v3108_v46 = vld [vmem:[%s5298_s6 + $0x1d8] sm:$0xff]  ;;  %v3137_v37 = vld [vmem:[%s5298_s6 + $0x2a0] sm:$0xff] }
 0x319   : > { %3606 = vmatpush1.bf16.msra.mxu1 %v3605_v39  ;;  %1680 = vmatprep.mubr.f32.mxu1 %v3981_v7  ;;  %v3615_v52 = vpack.c.bf16 %v3108_v46, %v3106_v50  ;;  %v3641_v39 = vpack.c.bf16 %v3137_v37, %v3135_v35  ;;  %v3645_v50 = vpack.c.bf16 %v3147_v44, %v3145_v43  ;;  %v2082_v43 = vld [vmem:[%s5301_s9] sm:$0x1f] }
 0x31a   : > { %3608 = vmatprep.subr.bf16.mxu1 %v3607_v40  ;;  %v3140_v40 = vld [vmem:[%s5298_s6 + $0x2b8] sm:$0xf]  ;;  %v3670_v44 = vpack.c.bf16 %v2166_v42, %v2165_v41  ;;  %v2697_v41 = vld [vmem:[%s5306_s14 + $0x48] sm:$0xff] }
 0x31c   : > { %3092 = vmatmul.mubr.msk.f32.gmra.mrb[14].mxu1 %vm1512_vm6, %v4543_v57 }
 0x31d   : > { %3610 = vmatpush1.bf16.msra.mxu1 %v3609_v45  ;;  %1787 = vmatprep.mubr.f32.mxu1 %v3981_v7  ;;  %v3150_v45 = vld [vmem:[%s5298_s6 + $0x2e8] sm:$0xff] }
 0x31e   : > { %3612 = vmatprep.subr.bf16.mxu1 %v3611_v47  ;;  %v3152_v47 = vld [vmem:[%s5298_s6 + $0x2f8] sm:$0xff] }
 0x31f   : > { %v3647_v46 = vpack.c.bf16 %v3152_v47, %v3150_v45  ;;  %v2167_v45 = vld [vmem:[%s5302_s10 + $0x10] sm:$0xff]  ;;  %v2168_v47 = vld [vmem:[%s5302_s10 + $0x18] sm:$0xff] }
 0x321   : > { %3614 = vmatpush1.bf16.msra.mxu1 %v3613_v51  ;;  %v3149_v51 = vld [vmem:[%s5298_s6 + $0x2e0] sm:$0xff] }
 0x322   : > { %3616 = vmatprep.subr.bf16.mxu1 %v3615_v52  ;;  %v3151_v52 = vld [vmem:[%s5298_s6 + $0x2f0] sm:$0xff] }
 0x323   : > { %v3649_v55 = vpack.c.bf16 %v3151_v52, %v3149_v51  ;;  %v2171_v51 = vld [vmem:[%s5302_s10 + $0x30] sm:$0xff]  ;;  %v2172_v52 = vld [vmem:[%s5302_s10 + $0x38] sm:$0xff] }
 0x324   : > { %v3679_v53 = vpack.c.bf16 %v2172_v52, %v2171_v51  ;;  %v2260_v51 = vld [vmem:[%s5303_s11 + $0x10] sm:$0xff]  ;;  %v2261_v52 = vld [vmem:[%s5303_s11 + $0x18] sm:$0xff] }
 0x325   : > { %3618 = vmatpush1.bf16.msra.mxu1 %v3617_v58  ;;  %v3153_v58 = vld [vmem:[%s5298_s6 + $0x300] sm:$0xff] }
 0x326   : > { %3620 = vmatprep.subr.bf16.mxu1 %v3619_v62  ;;  %v3155_v62 = vld [vmem:[%s5298_s6 + $0x310] sm:$0xff] }
 0x327   : > { %v3653_v0 = vpack.c.bf16 %v3155_v62, %v3153_v58  ;;  %v2175_v58 = vld [vmem:[%s5302_s10 + $0x50] sm:$0xff]  ;;  %v2176_v62 = vld [vmem:[%s5302_s10 + $0x58] sm:$0xff] }
 0x329   : > { %3622 = vmatpush1.bf16.msra.mxu1 %v3621_v1 }
 0x32a   : > { %3115 = vmatprep.subr.msk.mxu1 %vm1090_vm4, %v3114_v2  ;;  %v3157_v2 = vld [vmem:[%s5298_s6 + $0x320] sm:$0xff] }
 0x32b   : > { %v3657_v9 = vpack.c.bf16 %v3159_v3, %v3157_v2  ;;  %v2179_v2 = vld [vmem:[%s5302_s10 + $0x70] sm:$0xff]  ;;  %v2180_v3 = vld [vmem:[%s5302_s10 + $0x78] sm:$0xff] }
 0x32d   : > { %3116 = vmatpush1.msk.msra.mxu1 %vm1090_vm4, %v3113_v13  ;;  %v3661_v13 = vpack.c.bf16 %v3163_v12, %v3161_v11  ;;  %v2183_v11 = vld [vmem:[%s5302_s10 + $0x90] sm:$0xff]  ;;  %v2184_v12 = vld [vmem:[%s5302_s10 + $0x98] sm:$0xff] }
 0x32e   : > { %3117 = vmatmul.mubr.msk.f32.vlgmr.msra.gmra.mrb[12].mxu1 %vm1512_vm6, %v4565_v5  ;;  %3624 = vmatprep.subr.bf16.mxu1 %v3623_v14  ;;  %v3134_v5 = vld [vmem:[%s5298_s6 + $0x288] sm:$0xff] }
 0x32f   : > { %3626 = vmatpush1.bf16.msra.mxu1 %v3625_v15  ;;  %1793 = vmatprep.mubr.f32.mxu1 %v3981_v7  ;;  %v3635_v30 = vpack.c.bf16 %v3134_v5, %v3132_v28  ;;  %v3166_v14 = vld [vmem:[%s5298_s6 + $0x368] sm:$0xf]  ;;  %v3165_v15 = vld [vmem:[%s5298_s6 + $0x360] sm:$0xf] }
 0x330   : > { %3628 = vmatprep.subr.bf16.mxu1 %v3627_v16  ;;  %v2038_v16 = vld [vmem:[%s5299_s7] sm:$0x3] }
 0x331   : > { %v2043_v18 = vrot.slane %v2038_v16, %v4351_v36 }
 0x332   : > { %3118 = vmatmul.mubr.msk.f32.gmra.mrb[14].mxu1 %vm1512_vm6, %v1711_v59  ;;  %v3138_v59 = vld [vmem:[%s5298_s6 + $0x2a8] sm:$0xff] }
 0x333   : > { %3630 = vmatpush1.bf16.msra.mxu1 %v3629_v24  ;;  %1904 = vmatprep.mubr.f32.mxu1 %v3981_v7  ;;  %v3639_v32 = vpack.c.bf16 %v3138_v59, %v3136_v21  ;;  %v2063_v24 = vrot.slane %v2054_v17, %v4356_v38 }
 0x334   : > { %3632 = vmatprep.subr.bf16.mxu1 %v3631_v25 }
 0x337   : > { %3634 = vmatpush1.bf16.msra.mxu1 %v3633_v29 }
 0x338   : > { %3636 = vmatprep.subr.bf16.mxu1 %v3635_v30 }
 0x33b   : > { %3638 = vmatpush1.bf16.msra.mxu1 %v3637_v22 }
 0x33c   : > { %3640 = vmatprep.subr.bf16.mxu1 %v3639_v32 }
 0x33f   : > { %3642 = vmatpush1.bf16.msra.mxu1 %v3641_v39 }
 0x340   : > { %3141 = vmatprep.subr.msk.mxu1 %vm1090_vm4, %v3140_v40 }
 0x343   : > { %3142 = vmatpush1.msk.msra.mxu1 %vm1090_vm4, %v3139_v48  ;;  %v3673_v48 = vpack.c.bf16 %v2168_v47, %v2167_v45  ;;  %v2258_v47 = vld [vmem:[%s5303_s11] sm:$0xff] }
 0x344   : > { %3143 = vmatmul.mubr.msk.f32.vlgmr.msra.gmra.mrb[12].mxu1 %vm1512_vm6, %v4570_v6  ;;  %3644 = vmatprep.subr.bf16.mxu1 %v3643_v49  ;;  %v3160_v6 = vld [vmem:[%s5298_s6 + $0x338] sm:$0xff]  ;;  %v2169_v49 = vld [vmem:[%s5302_s10 + $0x20] sm:$0xff] }
 0x345   : > { %3646 = vmatpush1.bf16.msra.mxu1 %v3645_v50  ;;  %1910 = vmatprep.mubr.f32.mxu1 %v3981_v7  ;;  %v3655_v1 = vpack.c.bf16 %v3160_v6, %v3158_v63  ;;  %v2170_v50 = vld [vmem:[%s5302_s10 + $0x28] sm:$0xff]  ;;  %v3685_v63 = vpack.c.bf16 %v2176_v62, %v2175_v58  ;;  %v2177_v6 = vld [vmem:[%s5302_s10 + $0x60] sm:$0xff]  ;;  %v2264_v62 = vld [vmem:[%s5303_s11 + $0x30] sm:$0xff] }
 0x346   : > { %3648 = vmatprep.subr.bf16.mxu1 %v3647_v46  ;;  %v3676_v46 = vpack.c.bf16 %v2170_v50, %v2169_v49 }
 0x348   : > { %3144 = vmatmul.mubr.msk.f32.gmra.mrb[14].mxu1 %vm1512_vm6, %v1828_v60  ;;  %v3164_v60 = vld [vmem:[%s5298_s6 + $0x358] sm:$0xff] }
 0x349   : > { %3650 = vmatpush1.bf16.msra.mxu1 %v3649_v55  ;;  %2021 = vmatprep.mubr.f32.mxu1 %v3981_v7  ;;  %v3659_v10 = vpack.c.bf16 %v3164_v60, %v3162_v4  ;;  %v2174_v55 = vld [vmem:[%s5302_s10 + $0x48] sm:$0xff]  ;;  %v3691_v4 = vpack.c.bf16 %v2180_v3, %v2179_v2  ;;  %v2181_v60 = vld [vmem:[%s5302_s10 + $0x80] sm:$0xff] }
 0x34a   : > { %3652 = vmatprep.subr.bf16.mxu1 %v3651_v56  ;;  %v3682_v56 = vpack.c.bf16 %v2174_v55, %v2173_v54  ;;  %v3718_v54 = vpack.c.bf16 %v2261_v52, %v2260_v51  ;;  %v2262_v55 = vld [vmem:[%s5303_s11 + $0x20] sm:$0xff] }
 0x34b   : > { %v3187_v3 = vld [vmem:[%s5303_s11 + $0xa0] sm:$0xff] }
 0x34c   : > { %v2700_v52 = vld [vmem:[%s5306_s14 + $0x60] sm:$0xff] }
 0x34d   : > { %3654 = vmatpush1.bf16.msra.mxu1 %v3653_v0  ;;  %v2178_v0 = vld [vmem:[%s5302_s10 + $0x68] sm:$0xff] }
 0x34e   : > { %3656 = vmatprep.subr.bf16.mxu1 %v3655_v1  ;;  %v3688_v1 = vpack.c.bf16 %v2178_v0, %v2177_v6  ;;  %v2266_v0 = vld [vmem:[%s5303_s11 + $0x40] sm:$0xff] }
 0x351   : > { %3658 = vmatpush1.bf16.msra.mxu1 %v3657_v9  ;;  %v2182_v9 = vld [vmem:[%s5302_s10 + $0x88] sm:$0xff] }
 0x352   : > { %3660 = vmatprep.subr.bf16.mxu1 %v3659_v10  ;;  %v3694_v10 = vpack.c.bf16 %v2182_v9, %v2181_v60  ;;  %v3189_v9 = vld [vmem:[%s5303_s11 + $0xb0] sm:$0xff] }
 0x355   : > { %3662 = vmatpush1.bf16.msra.mxu1 %v3661_v13  ;;  %v3697_v13 = vpack.c.bf16 %v2184_v12, %v2183_v11  ;;  %v3191_v12 = vld [vmem:[%s5303_s11 + $0xc0] sm:$0xff] }
 0x356   : > { %3167 = vmatprep.subr.msk.mxu1 %vm1090_vm4, %v3166_v14  ;;  %v3175_v14 = vld [vmem:[%s5303_s11 + $0x50] sm:$0xff] }
 0x359   : > { %3168 = vmatpush1.msk.msra.mxu1 %vm1090_vm4, %v3165_v15  ;;  %v3176_v15 = vld [vmem:[%s5303_s11 + $0x58] sm:$0xff] }
 0x35a   : > { %3169 = vmatmul.mubr.msk.f32.vlgmr.msra.gmra.mrb[12].mxu1 %vm1512_vm6, %v4575_v8  ;;  %3774 = vmatprep.subr.bf16.mxu1 %v3983_v33  ;;  %v2047_v8 = vrot.slane %v2038_v16, %v4356_v38  ;;  %v3700_v17 = vpack.c.bf16 %v3176_v15, %v3175_v14  ;;  %v3193_v15 = vld [vmem:[%s5303_s11 + $0xd0] sm:$0xff] }
 0x35b   : > { %2027 = vmatprep.mubr.f32.mxu1 %v3981_v7 }
 0x35e   : > { %3170 = vmatmul.mubr.msk.f32.gmra.mrb[14].mxu1 %vm1512_vm6, %v1945_v61 }
 0x42d   : > { %v2023_v23 = vpop.f32.mrb[12].mxu1 }
 0x42e   : > { %v2050_v57 = vmul.f32 %v2043_v18, %v2023_v23  ;;  %v2025_v25 = vpop.f32.mrb[13].mxu1 }
 0x42f   : > { %v2051_v61 = vmul.f32 %v2047_v8, %v2025_v25 }
 0x430   : > { %v2066_v26 = vadd.f32 %v2059_v19, %v2050_v57  ;;  %v3180_v57 = vld [vmem:[%s5303_s11 + $0x78] sm:$0xff] }
 0x431   : > { %v2067_v27 = vadd.f32 %v2063_v24, %v2051_v61  ;;  %v2029_v28 = vpop.f32.mrb[14].mxu1  ;;  %v3181_v61 = vld [vmem:[%s5303_s11 + $0x80] sm:$0xff] }
 0x432   : > { %v2052_v5 = vmul.f32 %v2043_v18, %v2029_v28  ;;  %v2031_v29 = vpop.f32.mrb[15].mxu1  ;;  %v2074_v31 = vmul.f32 0.1, %v2066_v26  ;;  %vm2070_vm0 = vcmp.gt.f32.partialorder %v2066_v26, 0.0  ;;  %v3183_v28 = vld [vmem:[%s5303_s11 + $0x90] sm:$0xff] }
 0x433   : > { %v2053_v30 = vmul.f32 %v2047_v8, %v2031_v29  ;;  %v2075_v21 = vmul.f32 0.1, %v2067_v27  ;;  %vm2071_vm2 = vcmp.gt.f32.partialorder %v2067_v27, 0.0  ;;  %v3177_v8 = vld [vmem:[%s5303_s11 + $0x60] sm:$0xff] }
 0x434   : > { %v2068_v20 = vadd.f32 %v2059_v19, %v2052_v5  ;;  %v2078_v22 = vsel %vm2070_vm0, %v2066_v26, %v2074_v31  ;;  %v3178_v19 = vld [vmem:[%s5303_s11 + $0x68] sm:$0xff]  ;;  %v3184_v5 = vld [vmem:[%s5303_s11 + $0x98] sm:$0xff] }
 0x435   : > { %v2069_v59 = vadd.f32 %v2063_v24, %v2053_v30  ;;  %v2079_v35 = vsel %vm2071_vm2, %v2067_v27, %v2075_v21  ;;  %v3703_v23 = vpack.c.bf16 %v3178_v19, %v3177_v8  ;;  %v3179_v24 = vld [vmem:[%s5303_s11 + $0x70] sm:$0xff]  ;;  %v3182_v26 = vld [vmem:[%s5303_s11 + $0x88] sm:$0xff]  ;;  %v3712_v29 = vpack.c.bf16 %v3184_v5, %v3183_v28  ;;  %v2688_v30 = vld [vmem:[%s5306_s14] sm:$0xff] }
 0x436   : > { %vm2072_vm3 = vcmp.gt.f32.partialorder %v2068_v20, 0.0  ;;  %v2076_v36 = vmul.f32 0.1, %v2068_v20  ;;  %v3706_v25 = vpack.c.bf16 %v3180_v57, %v3179_v24  ;;  %v3709_v27 = vpack.c.bf16 %v3182_v26, %v3181_v61  ;;  %v2689_v31 = vld [vmem:[%s5306_s14 + $0x8] sm:$0xff]  ;;  %v3199_v24 = vld [vmem:[%s5303_s11 + $0xf8] sm:$0xff]  ;;  %v3200_v61 = vld [vmem:[%s5303_s11 + $0x100] sm:$0xff] }
 0x437   : > { %vm2073_vm8 = vcmp.gt.f32.partialorder %v2069_v59, 0.0  ;;  %v2077_v38 = vmul.f32 0.1, %v2069_v59  ;;  %v3775_v21 = vpack.c.bf16 %v2689_v31, %v2688_v30  ;;  %v3196_v8 = vld [vmem:[%s5303_s11 + $0xe8] sm:$0xff]  ;;  %v3202_v28 = vld [vmem:[%s5303_s11 + $0x110] sm:$0xff]  ;;  %v3203_v5 = vld [vmem:[%s5303_s11 + $0x118] sm:$0xff] }
 0x438   : > { %v2080_v32 = vsel %vm2072_vm3, %v2068_v20, %v2076_v36  ;;  %v2690_v20 = vld [vmem:[%s5306_s14 + $0x10] sm:$0xff]  ;;  %v3201_v26 = vld [vmem:[%s5303_s11 + $0x108] sm:$0xff]  ;;  %v3204_v30 = vld [vmem:[%s5303_s11 + $0x120] sm:$0xff] }
 0x439   : > { %v3666_v37 = vpack.c.bf16 %v2080_v32, %v2078_v22  ;;  %v2081_v39 = vsel %vm2073_vm8, %v2069_v59, %v2077_v38  ;;  %v2691_v59 = vld [vmem:[%s5306_s14 + $0x18] sm:$0xff]  ;;  %3776 = vmatpush3.bf16.msra.mxu1 %v3775_v21  ;;  %v2692_v38 = vld [vmem:[%s5306_s14 + $0x20] sm:$0xff]  ;;  %v2693_v22 = vld [vmem:[%s5306_s14 + $0x28] sm:$0xff] }
 0x43a   : > { %v3663_v40 = vpack.c.bf16 %v2081_v39, %v2079_v35  ;;  %v3778_v36 = vpack.c.bf16 %v2691_v59, %v2690_v20  ;;  %3777 = vmatprep.subr.bf16.mxu1 %v3983_v33  ;;  %v3781_v32 = vpack.c.bf16 %v2693_v22, %v2692_v38  ;;  %v2694_v35 = vld [vmem:[%s5306_s14 + $0x30] sm:$0xff]  ;;  %v3205_v31 = vld [vmem:[%s5303_s11 + $0x128] sm:$0xff]  ;;  %v3207_v59 = vld [vmem:[%s5303_s11 + $0x138] sm:$0xff] }
 0x43b   : > { %v3754_v20 = vpack.c.bf16 %v3205_v31, %v3204_v30  ;;  %v3206_v21 = vld [vmem:[%s5303_s11 + $0x130] sm:$0xff]  ;;  %v3209_v38 = vld [vmem:[%s5303_s11 + $0x140] sm:$0xff]  ;;  %v3210_v22 = vld [vmem:[%s5303_s11 + $0x148] sm:$0xff] }
 0x43c   : > { %3665 = vmatprep.subr.msk.bf16.mxu0 %vm3664_vm9, %v3663_v40  ;;  %v2696_v40 = vld [vmem:[%s5306_s14 + $0x40] sm:$0xff] }
 0x43d   : > { %3668 = vmatpush1.bf16.msk.msra.mxu0 %vm3664_vm9, %v3666_v37  ;;  %3779 = vmatpush3.bf16.msra.mxu1 %v3778_v36  ;;  %v2695_v37 = vld [vmem:[%s5306_s14 + $0x38] sm:$0xff]  ;;  %v3787_v42 = vpack.c.bf16 %v2697_v41, %v2696_v40  ;;  %v3757_v36 = vpack.c.bf16 %v3207_v59, %v3206_v21  ;;  %v3213_v41 = vld [vmem:[%s5303_s11 + $0x160] sm:$0xff] }
 0x43e   : > { %3669 = vmatprep.subr.bf16.mxu0 %v3983_v33  ;;  %3780 = vmatprep.subr.bf16.mxu1 %v3983_v33  ;;  %v3784_v39 = vpack.c.bf16 %v2695_v37, %v2694_v35  ;;  %v3211_v37 = vld [vmem:[%s5303_s11 + $0x150] sm:$0xff] }
 0x440   : > { %3173 = vmatmul.mubr.msk.f32.vlgmr.msra.gmra.mrb[8].mxu0 %vm2083_vm10, %v2082_v43  ;;  %v2698_v43 = vld [vmem:[%s5306_s14 + $0x50] sm:$0xff] }
 0x441   : > { %3671 = vmatpush1.bf16.msra.mxu0 %v3670_v44  ;;  %3782 = vmatpush3.bf16.msra.mxu1 %v3781_v32  ;;  %v2699_v44 = vld [vmem:[%s5306_s14 + $0x58] sm:$0xff]  ;;  %v3760_v32 = vpack.c.bf16 %v3210_v22, %v3209_v38 }
 0x442   : > { %3672 = vmatprep.subr.bf16.mxu0 %v3983_v33  ;;  %3783 = vmatprep.subr.bf16.mxu1 %v3983_v33  ;;  %v3790_v45 = vpack.c.bf16 %v2699_v44, %v2698_v43  ;;  %v3215_v44 = vld [vmem:[%s5303_s11 + $0x170] sm:$0xff] }
 0x445   : > { %3674 = vmatpush1.bf16.msra.mxu0 %v3673_v48  ;;  %3785 = vmatpush3.bf16.msra.mxu1 %v3784_v39  ;;  %v2259_v48 = vld [vmem:[%s5303_s11 + $0x8] sm:$0xff]  ;;  %v3212_v39 = vld [vmem:[%s5303_s11 + $0x158] sm:$0xff] }
 0x446   : > { %3675 = vmatprep.subr.bf16.mxu0 %v3983_v33  ;;  %3786 = vmatprep.subr.bf16.mxu1 %v3983_v33  ;;  %v3715_v50 = vpack.c.bf16 %v2259_v48, %v2258_v47  ;;  %v3763_v40 = vpack.c.bf16 %v3212_v39, %v3211_v37  ;;  %v3217_v48 = vld [vmem:[%s5303_s11 + $0x180] sm:$0xff] }
 0x449   : > { %3677 = vmatpush1.bf16.msra.mxu0 %v3676_v46  ;;  %3788 = vmatpush3.bf16.msra.mxu1 %v3787_v42  ;;  %v3214_v42 = vld [vmem:[%s5303_s11 + $0x168] sm:$0xff] }
 0x44a   : > { %3678 = vmatprep.subr.bf16.mxu0 %v3983_v33  ;;  %3789 = vmatprep.subr.bf16.mxu1 %v3983_v33  ;;  %v3766_v43 = vpack.c.bf16 %v3214_v42, %v3213_v41 }
 0x44d   : > { %3680 = vmatpush1.bf16.msra.mxu0 %v3679_v53  ;;  %3791 = vmatpush3.bf16.msra.mxu1 %v3790_v45  ;;  %v3216_v45 = vld [vmem:[%s5303_s11 + $0x178] sm:$0xff] }
 0x44e   : > { %3681 = vmatprep.subr.bf16.mxu0 %v3983_v33  ;;  %3792 = vmatprep.subr.bf16.mxu1 %v3983_v33  ;;  %v3769_v47 = vpack.c.bf16 %v3216_v45, %v3215_v44 }
 0x451   : > { %3683 = vmatpush1.bf16.msra.mxu0 %v3682_v56  ;;  %v2263_v56 = vld [vmem:[%s5303_s11 + $0x28] sm:$0xff] }
 0x452   : > { %3684 = vmatprep.subr.bf16.mxu0 %v3983_v33  ;;  %v3721_v58 = vpack.c.bf16 %v2263_v56, %v2262_v55  ;;  %v2702_v55 = vld [vmem:[%s5306_s14 + $0x70] sm:$0xff] }
 0x455   : > { %3686 = vmatpush1.bf16.msra.mxu0 %v3685_v63  ;;  %v2265_v63 = vld [vmem:[%s5303_s11 + $0x38] sm:$0xff] }
 0x456   : > { %3687 = vmatprep.subr.bf16.mxu0 %v3983_v33  ;;  %v3724_v6 = vpack.c.bf16 %v2265_v63, %v2264_v62 }
 0x459   : > { %3689 = vmatpush1.bf16.msra.mxu0 %v3688_v1  ;;  %v2267_v1 = vld [vmem:[%s5303_s11 + $0x48] sm:$0xff] }
 0x45a   : > { %3690 = vmatprep.subr.bf16.mxu0 %v3983_v33  ;;  %v3727_v2 = vpack.c.bf16 %v2267_v1, %v2266_v0  ;;  %v2782_v0 = vld [vmem:[%s5308_s16 + $0x8] sm:$0xff] }
 0x45d   : > { %3692 = vmatpush1.bf16.msra.mxu0 %v3691_v4  ;;  %v3188_v4 = vld [vmem:[%s5303_s11 + $0xa8] sm:$0xff] }
 0x45e   : > { %3693 = vmatprep.subr.bf16.mxu0 %v3983_v33  ;;  %v3730_v60 = vpack.c.bf16 %v3188_v4, %v3187_v3  ;;  %v2783_v4 = vld [vmem:[%s5308_s16 + $0x10] sm:$0xff] }
 0x461   : > { %3695 = vmatpush1.bf16.msra.mxu0 %v3694_v10  ;;  %v3190_v10 = vld [vmem:[%s5303_s11 + $0xb8] sm:$0xff] }
 0x462   : > { %3696 = vmatprep.subr.bf16.mxu0 %v3983_v33  ;;  %v3733_v11 = vpack.c.bf16 %v3190_v10, %v3189_v9 }
 0x465   : > { %3698 = vmatpush1.bf16.msra.mxu0 %v3697_v13  ;;  %v3192_v13 = vld [vmem:[%s5303_s11 + $0xc8] sm:$0xff] }
 0x466   : > { %3699 = vmatprep.subr.bf16.mxu0 %v3983_v33  ;;  %v3736_v14 = vpack.c.bf16 %v3192_v13, %v3191_v12  ;;  %v2786_v12 = vld [vmem:[%s5308_s16 + $0x28] sm:$0xff] }
 0x513   : > { %v2160_v16 = vpop.f32.mrb[8].mxu0 }
 0x514   : > { %v2162_v18 = vpop.f32.mrb[9].mxu0 }
 0x515   : > { %3174 = vmatprep.mubr.msk.f32.mxu0 %vm642_vm1, %v2162_v18  ;;  %vm3984_vm1 = vmmov 0   ;;  %v3195_v18 = vld [vmem:[%s5303_s11 + $0xe0] sm:$0xff] }
 0x516   : > { %2253 = vmatmul.mubr.f32.vlgmr.msra.gmra.mrb[10].mxu0 %v2160_v16  ;;  %3455 = vmatprep.mubr.msk.f32.mxu1 %vm3984_vm1, %v3981_v7  ;;  %v3194_v16 = vld [vmem:[%s5303_s11 + $0xd8] sm:$0xff]  ;;  %v3742_v19 = vpack.c.bf16 %v3196_v8, %v3195_v18  ;;  %v2790_v18 = vld [vmem:[%s5308_s16 + $0x48] sm:$0xff] }
 0x517   : > { %3701 = vmatpush3.bf16.msra.mxu0 %v3700_v17  ;;  %3330 = vmatprep.mubr.msk.f32.mxu0 %vm3984_vm1, %v3981_v7  ;;  %v3739_v17 = vpack.c.bf16 %v3194_v16, %v3193_v15  ;;  %v2788_v15 = vld [vmem:[%s5308_s16 + $0x38] sm:$0xff] }
 0x518   : > { %3702 = vmatprep.subr.bf16.mxu0 %v3983_v33 }
 0x51b   : > { %3704 = vmatpush3.bf16.msra.mxu0 %v3703_v23  ;;  %v3198_v23 = vld [vmem:[%s5303_s11 + $0xf0] sm:$0xff] }
 0x51c   : > { %3705 = vmatprep.subr.bf16.mxu0 %v3983_v33  ;;  %v3745_v57 = vpack.c.bf16 %v3199_v24, %v3198_v23 }
 0x51f   : > { %3707 = vmatpush3.bf16.msra.mxu0 %v3706_v25 }
 0x520   : > { %3708 = vmatprep.subr.bf16.mxu0 %v3983_v33 }
 0x523   : > { %3710 = vmatpush3.bf16.msra.mxu0 %v3709_v27  ;;  %v3748_v27 = vpack.c.bf16 %v3201_v26, %v3200_v61 }
 0x524   : > { %3711 = vmatprep.subr.bf16.mxu0 %v3983_v33 }
 0x527   : > { %3713 = vmatpush3.bf16.msra.mxu0 %v3712_v29  ;;  %v3751_v29 = vpack.c.bf16 %v3203_v5, %v3202_v28 }
 0x528   : > { %3714 = vmatprep.subr.bf16.mxu0 %v3983_v33 }
 0x5e9   : > { %v5023_v49 = vpop.f32.mrb[10].mxu0 }
 0x5ea   : > { %v2280_v46 = vrot.slane %v5023_v49, 1  ;;  %v2256_v53 = vpop.f32.mrb[11].mxu0  ;;  %v2437_v25 = vrot.slane %v5023_v49, 2  ;;  %v2522_v35 = vrot.slane %v5023_v49, 3  ;;  %v2607_v51 = vrot.slane %v5023_v49, 4 }
 0x5eb   : > { %v2701_v53 = vld [vmem:[%s5306_s14 + $0x68] sm:$0xff] }
 0x5ec   : > { %3331 = vmatmul.mubr.msk.f32.vlgmr.msra.gmra.mrb[12].mxu0 %vm2281_vm11, %v2280_v46 }
 0x5ed   : > { %3716 = vmatpush3.bf16.msra.mxu0 %v3715_v50  ;;  %3353 = vmatprep.mubr.msk.f32.mxu0 %vm3984_vm1, %v3981_v7  ;;  %v3218_v50 = vld [vmem:[%s5303_s11 + $0x188] sm:$0xff] }
 0x5ee   : > { %3717 = vmatprep.subr.bf16.mxu0 %v3983_v33  ;;  %v3772_v46 = vpack.c.bf16 %v3218_v50, %v3217_v48 }
 0x5f1   : > { %3719 = vmatpush3.bf16.msra.mxu0 %v3718_v54  ;;  %v3793_v54 = vpack.c.bf16 %v2701_v53, %v2700_v52 }
 0x5f2   : > { %3720 = vmatprep.subr.bf16.mxu0 %v3983_v33 }
 0x5f3   : > { %3794 = vmatpush3.bf16.msra.mxu1 %v3793_v54 }
 0x5f4   : > { %3453 = vmatprep.subr.mxu1 %v3981_v7 }
 0x5f5   : > { %3722 = vmatpush3.bf16.msra.mxu0 %v3721_v58  ;;  %v2683_v58 = vld [vmem:[%s5305_s13] sm:$0x1] }
 0x5f6   : > { %3723 = vmatprep.subr.bf16.mxu0 %v3983_v33 }
 0x5f7   : > { %3454 = vmatpush3.msra.mxu1 %v2702_v55 }
 0x5f8   : > { %3795 = vmatprep.subr.bf16.mxu1 %v3983_v33 }
 0x5f9   : > { %3725 = vmatpush3.bf16.msra.mxu0 %v3724_v6  ;;  %v2781_v6 = vld [vmem:[%s5308_s16] sm:$0xff] }
 0x5fa   : > { %3726 = vmatprep.subr.bf16.mxu0 %v3983_v33  ;;  %v3796_v3 = vpack.c.bf16 %v2782_v0, %v2781_v6 }
 0x5fd   : > { %3728 = vmatpush3.bf16.msra.mxu0 %v3727_v2 }
 0x5fe   : > { %3729 = vmatprep.subr.bf16.mxu0 %v3983_v33 }
 0x600   : > { %3354 = vmatmul.mubr.msk.f32.vlgmr.msra.gmra.mrb[12].mxu0 %vm2281_vm11, %v5023_v49  ;;  %v2681_v49 = vld [vmem:[%s5304_s12] sm:$0x1] }
 0x601   : > { %3731 = vmatpush3.bf16.msra.mxu0 %v3730_v60  ;;  %3376 = vmatprep.mubr.msk.f32.mxu0 %vm3984_vm1, %v3981_v7  ;;  %v2784_v60 = vld [vmem:[%s5308_s16 + $0x18] sm:$0xff] }
 0x602   : > { %3732 = vmatprep.subr.bf16.mxu0 %v3983_v33  ;;  %v3799_v10 = vpack.c.bf16 %v2784_v60, %v2783_v4 }
 0x605   : > { %3734 = vmatpush3.bf16.msra.mxu0 %v3733_v11  ;;  %v2785_v11 = vld [vmem:[%s5308_s16 + $0x20] sm:$0xff] }
 0x606   : > { %3735 = vmatprep.subr.bf16.mxu0 %v3983_v33  ;;  %v3802_v13 = vpack.c.bf16 %v2786_v12, %v2785_v11 }
 0x609   : > { %3737 = vmatpush3.bf16.msra.mxu0 %v3736_v14  ;;  %v2787_v14 = vld [vmem:[%s5308_s16 + $0x30] sm:$0xff] }
 0x60a   : > { %3738 = vmatprep.subr.bf16.mxu0 %v3983_v33  ;;  %v3805_v16 = vpack.c.bf16 %v2788_v15, %v2787_v14 }
 0x60d   : > { %3740 = vmatpush3.bf16.msra.mxu0 %v3739_v17  ;;  %v2789_v17 = vld [vmem:[%s5308_s16 + $0x40] sm:$0xff] }
 0x60e   : > { %3741 = vmatprep.subr.bf16.mxu0 %v3983_v33  ;;  %v3808_v8 = vpack.c.bf16 %v2790_v18, %v2789_v17 }
 0x611   : > { %3743 = vmatpush3.bf16.msra.mxu0 %v3742_v19  ;;  %v2791_v19 = vld [vmem:[%s5308_s16 + $0x50] sm:$0xf] }
 0x612   : > { %3744 = vmatprep.subr.bf16.mxu0 %v3983_v33 }
 0x614   : > { %3377 = vmatmul.mubr.msk.f32.vlgmr.msra.gmra.mrb[12].mxu0 %vm2281_vm11, %v2437_v25 }
 0x615   : > { %3746 = vmatpush3.bf16.msra.mxu0 %v3745_v57  ;;  %3399 = vmatprep.mubr.msk.f32.mxu0 %vm3984_vm1, %v3981_v7 }
 0x616   : > { %3747 = vmatprep.subr.bf16.mxu0 %v3983_v33 }
 0x619   : > { %3749 = vmatpush3.bf16.msra.mxu0 %v3748_v27 }
 0x61a   : > { %3750 = vmatprep.subr.bf16.mxu0 %v3983_v33 }
 0x61d   : > { %3752 = vmatpush3.bf16.msra.mxu0 %v3751_v29 }
 0x61e   : > { %3753 = vmatprep.subr.bf16.mxu0 %v3983_v33 }
 0x621   : > { %3755 = vmatpush3.bf16.msra.mxu0 %v3754_v20 }
 0x622   : > { %3756 = vmatprep.subr.bf16.mxu0 %v3983_v33 }
 0x625   : > { %3758 = vmatpush3.bf16.msra.mxu0 %v3757_v36 }
 0x626   : > { %3759 = vmatprep.subr.bf16.mxu0 %v3983_v33 }
 0x628   : > { %3400 = vmatmul.mubr.msk.f32.vlgmr.msra.gmra.mrb[12].mxu0 %vm2281_vm11, %v2522_v35 }
 0x629   : > { %3761 = vmatpush3.bf16.msra.mxu0 %v3760_v32  ;;  %3422 = vmatprep.mubr.msk.f32.mxu0 %vm3984_vm1, %v3981_v7  ;;  %v2886_v32 = vand.u32 127, %v1205_v34 }
 0x62a   : > { %3762 = vmatprep.subr.bf16.mxu0 %v3983_v33 }
 0x62d   : > { %3764 = vmatpush3.bf16.msra.mxu0 %v3763_v40 }
 0x62e   : > { %3765 = vmatprep.subr.bf16.mxu0 %v3983_v33 }
 0x631   : > { %3767 = vmatpush3.bf16.msra.mxu0 %v3766_v43 }
 0x632   : > { %3768 = vmatprep.subr.bf16.mxu0 %v3983_v33 }
 0x635   : > { %3770 = vmatpush3.bf16.msra.mxu0 %v3769_v47 }
 0x636   : > { %3771 = vmatprep.subr.bf16.mxu0 %v3983_v33 }
 0x639   : > { %3773 = vmatpush3.bf16.msra.mxu0 %v3772_v46 }
 0x63c   : > { %3423 = vmatmul.mubr.msk.f32.vlgmr.msra.gmra.mrb[12].mxu0 %vm2281_vm11, %v2607_v51 }
 0x70f   : > { %v2676_v56 = vpop.f32.mrb[12].mxu0 }
 0x710   : > { %v2682_v62 = vmul.f32 %v2681_v49, %v2676_v56  ;;  %v3424_v63 = vpop.f32.mrb[13].mxu0 }
 0x712   : > { %v2684_v1 = vadd.f32 %v2683_v58, %v2682_v62 }
 0x714   : > { %vm2685_vm12 = vcmp.gt.f32.partialorder %v2684_v1, 0.0  ;;  %v2686_v2 = vmul.f32 0.1, %v2684_v1 }
 0x716   : > { %v2687_v9 = vsel %vm2685_vm12, %v2684_v1, %v2686_v2 }
 0x717   : > { %3456 = vmatmul.mubr.msk.f32.vlgmr.msra.gmra.mrb[16].mxu1 %vm2704_vm13, %v2687_v9 }
 0x718   : > { %3797 = vmatpush3.bf16.msra.mxu1 %v3796_v3  ;;  %3480 = vmatprep.mubr.msk.f32.mxu1 %vm3984_vm1, %v3981_v7 }
 0x719   : > { %3798 = vmatprep.subr.bf16.mxu1 %v3983_v33 }
 0x71c   : > { %3800 = vmatpush3.bf16.msra.mxu1 %v3799_v10 }
 0x71d   : > { %3801 = vmatprep.subr.bf16.mxu1 %v3983_v33 }
 0x720   : > { %3803 = vmatpush3.bf16.msra.mxu1 %v3802_v13 }
 0x721   : > { %3804 = vmatprep.subr.bf16.mxu1 %v3983_v33 }
 0x724   : > { %3806 = vmatpush3.bf16.msra.mxu1 %v3805_v16 }
 0x725   : > { %3807 = vmatprep.subr.bf16.mxu1 %v3983_v33  ;;  %v2703_v33 = vld [vmem:[%s5307_s15] sm:$0x1] }
 0x728   : > { %3809 = vmatpush3.bf16.msra.mxu1 %v3808_v8 }
 0x729   : > { %3478 = vmatprep.subr.mxu1 %v3981_v7  ;;  %v2792_v7 = vld [vmem:[%s5309_s17] sm:$0x1] }
 0x72c   : > { %3479 = vmatpush3.msk.msra.mxu1 %vm1090_vm4, %v2791_v19 }
 0x7ea   : > { %v2774_v23 = vpop.f32.mrb[16].mxu1 }
 0x7eb   : > { %v2775_v24 = vadd.f32 %v2774_v23, %v2703_v33  ;;  %v3457_v57 = vpop.f32.mrb[17].mxu1 }
 0x7ed   : > { %vm2778_vm14 = vcmp.gt.f32.partialorder %v2775_v24, 0.0  ;;  %v2779_v25 = vmul.f32 0.1, %v2775_v24 }
 0x7ef   : > { %v2780_v61 = vsel %vm2778_vm14, %v2775_v24, %v2779_v25 }
 0x7f0   : > { %3481 = vmatmul.mubr.msk.f32.vlgmr.msra.gmra.mrb[18].mxu1 %vm1512_vm6, %v2780_v61 }
 0x8c3   : > { %v2865_v26 = vpop.f32.mrb[18].mxu1 }
 0x8c4   : > { %v2866_v27 = vadd.f32 %v2865_v26, %v2792_v7  ;;  %v3482_v28 = vpop.f32.mrb[19].mxu1 }
 0x8c6   : > { %v2870_v5 = vsel %vm2869_vm15, %v2866_v27, -inf }
 0x8c7   : > { %2871 = vmax.xlane.f32.xlu0 %v2870_v5 }
 0x954   : > { %v2872_v29 = vpop.xlane.xlu0 %2871 }
 0x955   : > { %v2873_v30 = vsub.f32 %v2866_v27, %v2872_v29 }
 0x957   : > { %v2874_v31 = vmul.f32 1.442695, %v2873_v30 }
 0x959   : > { %3913 = vpow2.f32 %v2874_v31 }
 0x963   : > { %v3914_v20 = vpop.eup %3913 }
 0x964   : > { %v2876_v21 = vsel %vm2869_vm15, %v3914_v20, 0.0 }
 0x965   : > { %2877 = vadd.xlane.f32.xlu0 %v2876_v21 }
 0x9f2   : > { %v2878_v59 = vpop.xlane.xlu0 %2877 }
 0x9f3   : > { %3915 = vrcp.f32 %v2878_v59 }
 0x9fd   : > { %v3916_v36 = vpop.eup %3915 }
 0x9fe   : > { %v2880_v38 = vmul.f32 %v3916_v36, %v3914_v20 }
 0xa00   : > { %v2882_v22 = vsel %vm2869_vm15, %v2880_v38, -inf  ;;  %2881 = vst.msk [vmem:[%s595_s2] sm:$0x1] %vm2869_vm15, %v2880_v38 }
 0xa01   : > { %2883 = vmax.xlane.f32.xlu1 %v2882_v22 }
 0xa8e   : > { %v2884_v35 = vpop.xlane.xlu1 %2883 }
 0xa8f   : > { %vm2887_vm4 = vcmp.ge.f32.partialorder %v2880_v38, %v2884_v35 }
 0xa90   : > { %v2888_v37 = vsel %vm2887_vm4, %v2886_v32, 10 }
 0xa91   : > { %v2889_v39 = vsel %vm2869_vm15, %v2888_v37, 2147483647 }
 0xa92   : > { %v2891_v40 = vshra.s32 %v2889_v39, 16  ;;  %v2890_v42 = vand.u32 65535, %v2889_v39 }
 0xa94   : > { %v2893_v41 = vcvt.s32.f32 %v2891_v40  ;;  %v2892_v44 = vcvt.s32.f32 %v2890_v42 }
 0xa96   : > { %2894 = vmin.xlane.f32.xlu1 %v2893_v41 }
 0xb23   : > { %v2895_v43 = vpop.xlane.xlu1 %2894 }
 0xb24   : > { %vm2896_vm5 = vcmp.eq.f32.partialorder %v2893_v41, %v2895_v43 }
 0xb25   : > { %v2897_v45 = vsel %vm2896_vm5, %v2892_v44, inf }
 0xb26   : > { %2898 = vmin.xlane.f32.xlu0 %v2897_v45 }
 0xb27   : > { %3930 = shalt.err (!%p3927_p3)
}
 0xb28   : > { %s3931_s1 = scalar_lea.hbm %s5252_s25, 16  ;;  %s3935_s26 = scalar_lea.hbm %s5310_s18, 32 }
 0xb29   : > { %p3932_p4 = scmp.ne.s32.totalorder %s5252_s25, %s3931_s1  ;;  %p3936_p9 = scmp.lt.u32.totalorder %s5252_s25, %s5310_s18 }
 0xb2a   : > { %p3937_p10 = scmp.lt.u32.totalorder %s3935_s26, %s3931_s1  ;;  %p3939_p12 = scmp.lt.u32.totalorder %s3931_s1, %s5252_s25 }
 0xb2b   : > { %p3933_p7 = pnand %p3932_p4, %p4124_p5 }
 0xb2c   : > { %p3938_p11 = por %p3937_p10, %p3936_p9 }
 0xb2d   : > { %p3934_p8 = pneg %p3933_p7 }
 0xb2e   : > { %p3940_p13 = por %p3939_p12, %p3938_p11 }
 0xb30   : > { %p3941_p0 = pnand %p3940_p13, %p3934_p8 }
 0xb32   : > { %3944 = shalt.err (!%p3941_p0)
}
 0xb33   : > { %3870 = dma.vmem_to_hbm [thread:$0]  (%p4124_p5), %s2923_s23, 16, %s5252_s25, %s2907_s22   ;;  %v2901_v34 = vcvt.f32.s32 %v2895_v43  ;;  %vm2904_vm6 = vcmask 0  }
 0xb34   : > { %s5338_s21 = sld [smem:[#allocation16_spill]] }
 0xb35   : > { %v2902_v48 = vshll.u32 %v2901_v34, 16 }
 0xb3a   : > { %s608_s28 = scalar_lea.vmem %s5338_s21, %s4162_s0 }
 0xbb3   : > { %v2899_v47 = vpop.xlane.xlu0 %2898 }
 0xbb4   : > { %v2900_v50 = vcvt.f32.s32 %v2899_v47 }
 0xbb6   : > { %v2903_v46 = vadd.s32 %v2902_v48, %v2900_v50 }
 0xbb8   : > { %2905 = vst.msk [vmem:[%s608_s28] sm:$0x1] %vm2904_vm6, %v2903_v46 }
 0xbb9 PF: > { %s5339_s1 = sld [smem:[#allocation7_spill]]  ;;  %s5340_s20 = sld [smem:[#allocation5_spill]] }
 0xbbf   : > { %p3876_p1 = scmp.ge.s32.totalorder %s5339_s1, 2  ;;  %s2937_s3 = sand.u32 1, %s5340_s20  }
 0xbc0   : > { %s2938_s23 = scalar_lea.sflag [#allocation3], %s2937_s3 }
 0xbc1   : > { %p3873_p2 = pnand %p3876_p1, %p4128_p6 }
 0xbc3   : > { %3962 = dma.done.wait (!%p3873_p2), %s2938_s23, 16  }
 0xbc4   : > { %3964 = vsyncadd (!%p3873_p2), %s2938_s23, 4294967280  ;;  %s5342_s21 = sld [smem:[#allocation8_spill]]  ;;  %s5343_s25 = sld [smem:[#allocation6_spill]] }
 0xbc5   : > { %s5344_s20 = sld [smem:[#allocation9_spill]]  ;;  %s5345_s0 = smov %s3971_s30 }
 0xbca   : > { %p30_p5 = scmp.ge.s32.totalorder %s5342_s21, 4   ;;  %s5346_s30 = smov %s5343_s25 }
 0xbcc   :  { %32 = sbr.rel (!%p30_p5) target bundleno = 10 (0xa), region = 151 }
 0xbd3   :  { %2948 = vsyncpa [#allocation3], 1 }
 0xbd4   :  { %2950 = vsyncpa [#allocation3 + $0x1], 1 }

</bundles_post_ra>
